<compile_context>
chip_gen: v5e
topology: v5e:2x2
jax: 0.10.0
libtpu: 0.0.40
codegen_flags: <defaults>
</compile_context>

<pallas_src>
import functools

import jax
import jax.numpy as jnp
from jax.experimental import pallas as pl

HIDDEN_DIM = 128


def _softplus(x):
    # numerically stable softplus built only from exp/log (EUP-friendly,
    # avoids log1p/logaddexp lowering paths).
    return jnp.maximum(x, 0.0) + jnp.log(1.0 + jnp.exp(-jnp.abs(x)))


def _graph_encoder_kernel(x_ref, adj_ref,
                          wqkv1_ref, bqkv1_ref, ws1_ref, bs1_ref,
                          wqkv2_ref, bqkv2_ref, ws2_ref, bs2_ref,
                          wqkv3_ref, bqkv3_ref, ws3_ref, bs3_ref,
                          out_ref, *, heads, out_channels, z_dim):
    adj = adj_ref[...] > 0.5  # (N, N) bool, adj[i, j] == edge j -> i

    def transformer_conv(h, wqkv_ref, bqkv_ref, ws_ref, bs_ref, C):
        n = h.shape[0]
        HC = heads * C
        # Fused q|k|v projection (query weights pre-scaled by 1/sqrt(C) in the
        # wrapper) and the root/skip projection — two wide MXU passes.
        qkv = (jnp.dot(h, wqkv_ref[...], preferred_element_type=jnp.float32)
               + bqkv_ref[...])
        skip = (jnp.dot(h, ws_ref[...], preferred_element_type=jnp.float32)
                + bs_ref[...])
        v_all = qkv[:, 2 * HC:3 * HC]                      # (N, H*C)
        col = jax.lax.broadcasted_iota(jnp.int32, (n, HC), 1)

        out = skip
        for hd in range(heads):
            q = qkv[:, hd * C:(hd + 1) * C]                # (N, C)
            k = qkv[:, HC + hd * C:HC + (hd + 1) * C]      # (N, C)
            # scores[i, j] = q_i . k_j  (contract on feature dim, no transpose)
            scores = jax.lax.dot_general(
                q, k, (((1,), (1,)), ((), ())),
                preferred_element_type=jnp.float32)        # (N, N)
            scores = jnp.where(adj, scores, jnp.float32(-1e30))
            m = jnp.max(scores, axis=-1, keepdims=True)
            p = jnp.where(adj, jnp.exp(scores - m), 0.0)
            denom = jnp.sum(p, axis=-1, keepdims=True)
            # nodes with no in-edges aggregate zero messages (PyG semantics)
            alpha = p / jnp.maximum(denom, jnp.float32(1e-30))
            # lane-dense head merge: keep only this head's columns of V and
            # accumulate — avoids lane-unaligned concatenation.
            head_mask = (col >= hd * C) & (col < (hd + 1) * C)
            v_h = jnp.where(head_mask, v_all, 0.0)
            out = out + jnp.dot(alpha, v_h,
                                preferred_element_type=jnp.float32)
        return out

    h = transformer_conv(x_ref[...], wqkv1_ref, bqkv1_ref, ws1_ref, bs1_ref,
                         out_channels[0])
    h = jnp.maximum(h, 0.0)
    h = transformer_conv(h, wqkv2_ref, bqkv2_ref, ws2_ref, bs2_ref,
                         out_channels[1])
    h = jnp.maximum(h, 0.0)
    params = transformer_conv(h, wqkv3_ref, bqkv3_ref, ws3_ref, bs3_ref,
                              out_channels[2])

    # Fused epilogue: mu = params[:, :z_dim]; sigma = softplus(rest) + 1e-7.
    # Computed over the full tile and selected with a lane mask; stored as a
    # single lane-contiguous output (wrapper splits mu / sigma).
    colp = jax.lax.broadcasted_iota(jnp.int32, params.shape, 1)
    sp = _softplus(params) + jnp.float32(1e-7)
    out_ref[...] = jnp.where(colp < z_dim, params, sp)


def graph_encoder(x, edge_index, params, *, z_dim, heads):
    """Forward pass of GraphEncoder. Returns (mu, sigma), each (N, z_dim)."""
    N, _ = x.shape
    c3 = (2 * z_dim) // heads
    assert c3 * heads == 2 * z_dim, "heads must divide 2 * z_dim"
    cs = (HIDDEN_DIM, HIDDEN_DIM, c3)

    # Dense adjacency mask: A[i, j] = 1 iff edge j -> i
    # (edge_index row 0 = source j, row 1 = target i).
    adj = jnp.zeros((N, N), jnp.float32).at[
        edge_index[1], edge_index[0]].set(1.0)

    def pack(l, C):
        inv = jnp.float32(1.0 / (float(C) ** 0.5))  # fold 1/sqrt(C) into Wq/bq
        wqkv = jnp.concatenate(
            [params[f"wq{l}"] * inv, params[f"wk{l}"], params[f"wv{l}"]],
            axis=1)
        bqkv = jnp.concatenate(
            [params[f"bq{l}"] * inv, params[f"bk{l}"], params[f"bv{l}"]],
            axis=1)
        return [wqkv, bqkv, params[f"ws{l}"], params[f"bs{l}"]]

    inputs = [x.astype(jnp.float32), adj]
    for l, C in zip((1, 2, 3), cs):
        inputs += pack(l, C)

    def full_spec(arr):
        return pl.BlockSpec(arr.shape, lambda: tuple(0 for _ in arr.shape))

    kernel = functools.partial(_graph_encoder_kernel, heads=heads,
                               out_channels=cs, z_dim=z_dim)

    fused = pl.pallas_call(
        kernel,
        out_shape=jax.ShapeDtypeStruct((N, 2 * z_dim), jnp.float32),
        grid=(),
        in_specs=[full_spec(a) for a in inputs],
        out_specs=pl.BlockSpec((N, 2 * z_dim), lambda: (0, 0)),
    )(*inputs)

    return fused[:, :z_dim], fused[:, z_dim:]


def init_params(key, input_dim, z_dim, heads):
    """nn.Linear-style init (uniform +-1/sqrt(fan_in)).

    Weights stored pre-transposed as (in_features, out_features); biases as
    (1, out_features). Per layer l: wq/wk/wv (attention projections) and ws
    (root/skip projection), each with out = heads * out_channels_l.
    """
    c3 = (2 * z_dim) // heads
    layer_dims = {1: (input_dim, HIDDEN_DIM),
                  2: (HIDDEN_DIM * heads, HIDDEN_DIM),
                  3: (HIDDEN_DIM * heads, c3)}
    out = {}
    keys = jax.random.split(key, 8 * len(layer_dims))
    ki = 0
    for l, (din, C) in layer_dims.items():
        dout = heads * C
        bound = 1.0 / (float(din) ** 0.5)
        for name in ("q", "k", "v", "s"):
            out[f"w{name}{l}"] = jax.random.uniform(
                keys[ki], (din, dout), jnp.float32, -bound, bound)
            out[f"b{name}{l}"] = jax.random.uniform(
                keys[ki + 1], (1, dout), jnp.float32, -bound, bound)
            ki += 2
    return out


if __name__ == "__main__":
    # Small shapes consistent with the module (hidden_dim = 128 is fixed).
    N = 16          # graph nodes
    input_dim = 32
    z_dim = 16
    heads = 2

    key = jax.random.PRNGKey(0)
    kx, kp = jax.random.split(key)

    x = jax.random.normal(kx, (N, input_dim), jnp.float32)

    # Deterministic small graph: two out-edges per node (ring + skip-5).
    idx = jnp.arange(N, dtype=jnp.int32)
    src = jnp.concatenate([idx, idx])
    dst = jnp.concatenate([(idx + 1) % N, (idx + 5) % N])
    edge_index = jnp.stack([src, dst])          # (2, E) = [source; target]

    params = init_params(kp, input_dim, z_dim, heads)

    mu, sigma = graph_encoder(x, edge_index, params, z_dim=z_dim, heads=heads)
    jax.block_until_ready((mu, sigma))

    assert mu.shape == (N, z_dim)
    assert sigma.shape == (N, z_dim)
    assert bool(jnp.all(sigma > 0.0))
    print("KERNEL_OK")
</pallas_src>

<mosaic_0001>
module attributes {stable_mosaic.version = 11 : i64} {
  func.func @_graph_encoder_kernel(%arg0: memref<16x32xf32, #tpu.memory_space<vmem>>, %arg1: memref<16x16xf32, #tpu.memory_space<vmem>>, %arg2: memref<32x768xf32, #tpu.memory_space<vmem>>, %arg3: memref<1x768xf32, #tpu.memory_space<vmem>>, %arg4: memref<32x256xf32, #tpu.memory_space<vmem>>, %arg5: memref<1x256xf32, #tpu.memory_space<vmem>>, %arg6: memref<256x768xf32, #tpu.memory_space<vmem>>, %arg7: memref<1x768xf32, #tpu.memory_space<vmem>>, %arg8: memref<256x256xf32, #tpu.memory_space<vmem>>, %arg9: memref<1x256xf32, #tpu.memory_space<vmem>>, %arg10: memref<256x96xf32, #tpu.memory_space<vmem>>, %arg11: memref<1x96xf32, #tpu.memory_space<vmem>>, %arg12: memref<256x32xf32, #tpu.memory_space<vmem>>, %arg13: memref<1x32xf32, #tpu.memory_space<vmem>>, %arg14: memref<16x32xf32, #tpu.memory_space<vmem>>) attributes {dimension_semantics = [], scalar_prefetch = 0 : i64, scratch_operands = 0 : i64, tpu.core_type = #tpu.core_type<tc>} {
    %c0 = arith.constant 0 : index
    %c0_0 = arith.constant 0 : index
    %0 = vector.load %arg1[%c0, %c0_0] : memref<16x16xf32, #tpu.memory_space<vmem>>, vector<16x16xf32>
    %cst = arith.constant 5.000000e-01 : f32
    %1 = vector.broadcast %cst : f32 to vector<16x16xf32>
    %2 = arith.cmpf ogt, %0, %1 : vector<16x16xf32>
    %c0_1 = arith.constant 0 : index
    %c0_2 = arith.constant 0 : index
    %3 = vector.load %arg0[%c0_1, %c0_2] : memref<16x32xf32, #tpu.memory_space<vmem>>, vector<16x32xf32>
    %c0_3 = arith.constant 0 : index
    %c0_4 = arith.constant 0 : index
    %4 = vector.load %arg2[%c0_3, %c0_4] : memref<32x768xf32, #tpu.memory_space<vmem>>, vector<32x768xf32>
    %cst_5 = arith.constant dense<0.000000e+00> : vector<16x768xf32>
    %5 = tpu.matmul %3, %4, %cst_5 {dimension_numbers = #tpu.dot_dimension_numbers<[1], [0], [0], [1], [0, 0, 1, 1], [], []>} : vector<16x32xf32>, vector<32x768xf32>, vector<16x768xf32> -> vector<16x768xf32>
    %c0_6 = arith.constant 0 : index
    %c0_7 = arith.constant 0 : index
    %6 = vector.load %arg3[%c0_6, %c0_7] : memref<1x768xf32, #tpu.memory_space<vmem>>, vector<1x768xf32>
    %7 = vector.broadcast %6 : vector<1x768xf32> to vector<16x768xf32>
    %8 = arith.addf %5, %7 : vector<16x768xf32>
    %c0_8 = arith.constant 0 : index
    %c0_9 = arith.constant 0 : index
    %9 = vector.load %arg4[%c0_8, %c0_9] : memref<32x256xf32, #tpu.memory_space<vmem>>, vector<32x256xf32>
    %cst_10 = arith.constant dense<0.000000e+00> : vector<16x256xf32>
    %10 = tpu.matmul %3, %9, %cst_10 {dimension_numbers = #tpu.dot_dimension_numbers<[1], [0], [0], [1], [0, 0, 1, 1], [], []>} : vector<16x32xf32>, vector<32x256xf32>, vector<16x256xf32> -> vector<16x256xf32>
    %c0_11 = arith.constant 0 : index
    %c0_12 = arith.constant 0 : index
    %11 = vector.load %arg5[%c0_11, %c0_12] : memref<1x256xf32, #tpu.memory_space<vmem>>, vector<1x256xf32>
    %12 = vector.broadcast %11 : vector<1x256xf32> to vector<16x256xf32>
    %13 = arith.addf %10, %12 : vector<16x256xf32>
    %14 = vector.extract_strided_slice %8 {offsets = [0, 512], sizes = [16, 256], strides = [1, 1]} : vector<16x768xf32> to vector<16x256xf32>
    %15 = tpu.iota {dimensions = array<i32: 1>} : vector<16x256xi32>
    %16 = vector.extract_strided_slice %8 {offsets = [0, 0], sizes = [16, 128], strides = [1, 1]} : vector<16x768xf32> to vector<16x128xf32>
    %17 = vector.extract_strided_slice %8 {offsets = [0, 256], sizes = [16, 128], strides = [1, 1]} : vector<16x768xf32> to vector<16x128xf32>
    %cst_13 = arith.constant dense<0.000000e+00> : vector<16x16xf32>
    %18 = tpu.matmul %16, %17, %cst_13 {dimension_numbers = #tpu.dot_dimension_numbers<[1], [1], [0], [0], [0, 0, 1, 0], [], []>} : vector<16x128xf32>, vector<16x128xf32>, vector<16x16xf32> -> vector<16x16xf32>
    %cst_14 = arith.constant -1.000000e+30 : f32
    %19 = vector.broadcast %cst_14 : f32 to vector<16x16xf32>
    %20 = arith.select %2, %18, %19 : vector<16x16xi1>, vector<16x16xf32>
    %cst_15 = arith.constant dense<0xFF800000> : vector<16xf32>
    %21 = vector.multi_reduction <maximumf>, %20, %cst_15 [1] : vector<16x16xf32> to vector<16xf32>
    %22 = vector.shape_cast %21 : vector<16xf32> to vector<16x1xf32>
    %23 = vector.broadcast %22 : vector<16x1xf32> to vector<16x16xf32>
    %24 = arith.subf %20, %23 : vector<16x16xf32>
    %25 = math.exp %24 : vector<16x16xf32>
    %cst_16 = arith.constant 0.000000e+00 : f32
    %26 = vector.broadcast %cst_16 : f32 to vector<16x16xf32>
    %27 = arith.select %2, %25, %26 : vector<16x16xi1>, vector<16x16xf32>
    %cst_17 = arith.constant dense<0.000000e+00> : vector<16xf32>
    %28 = vector.multi_reduction <add>, %27, %cst_17 [1] : vector<16x16xf32> to vector<16xf32>
    %29 = vector.shape_cast %28 : vector<16xf32> to vector<16x1xf32>
    %cst_18 = arith.constant 1.000000e-30 : f32
    %30 = vector.broadcast %cst_18 : f32 to vector<16x1xf32>
    %31 = arith.maximumf %29, %30 : vector<16x1xf32>
    %32 = vector.broadcast %31 : vector<16x1xf32> to vector<16x16xf32>
    %33 = arith.divf %27, %32 : vector<16x16xf32>
    %c0_i32 = arith.constant 0 : i32
    %34 = vector.broadcast %c0_i32 : i32 to vector<16x256xi32>
    %35 = arith.cmpi sge, %15, %34 : vector<16x256xi32>
    %c128_i32 = arith.constant 128 : i32
    %36 = vector.broadcast %c128_i32 : i32 to vector<16x256xi32>
    %37 = arith.cmpi slt, %15, %36 : vector<16x256xi32>
    %38 = arith.andi %35, %37 : vector<16x256xi1>
    %cst_19 = arith.constant 0.000000e+00 : f32
    %39 = vector.broadcast %cst_19 : f32 to vector<16x256xf32>
    %40 = arith.select %38, %14, %39 : vector<16x256xi1>, vector<16x256xf32>
    %cst_20 = arith.constant dense<0.000000e+00> : vector<16x256xf32>
    %41 = tpu.matmul %33, %40, %cst_20 {dimension_numbers = #tpu.dot_dimension_numbers<[1], [0], [0], [1], [0, 0, 1, 1], [], []>} : vector<16x16xf32>, vector<16x256xf32>, vector<16x256xf32> -> vector<16x256xf32>
    %42 = arith.addf %13, %41 : vector<16x256xf32>
    %43 = vector.extract_strided_slice %8 {offsets = [0, 128], sizes = [16, 128], strides = [1, 1]} : vector<16x768xf32> to vector<16x128xf32>
    %44 = vector.extract_strided_slice %8 {offsets = [0, 384], sizes = [16, 128], strides = [1, 1]} : vector<16x768xf32> to vector<16x128xf32>
    %cst_21 = arith.constant dense<0.000000e+00> : vector<16x16xf32>
    %45 = tpu.matmul %43, %44, %cst_21 {dimension_numbers = #tpu.dot_dimension_numbers<[1], [1], [0], [0], [0, 0, 1, 0], [], []>} : vector<16x128xf32>, vector<16x128xf32>, vector<16x16xf32> -> vector<16x16xf32>
    %cst_22 = arith.constant -1.000000e+30 : f32
    %46 = vector.broadcast %cst_22 : f32 to vector<16x16xf32>
    %47 = arith.select %2, %45, %46 : vector<16x16xi1>, vector<16x16xf32>
    %cst_23 = arith.constant dense<0xFF800000> : vector<16xf32>
    %48 = vector.multi_reduction <maximumf>, %47, %cst_23 [1] : vector<16x16xf32> to vector<16xf32>
    %49 = vector.shape_cast %48 : vector<16xf32> to vector<16x1xf32>
    %50 = vector.broadcast %49 : vector<16x1xf32> to vector<16x16xf32>
    %51 = arith.subf %47, %50 : vector<16x16xf32>
    %52 = math.exp %51 : vector<16x16xf32>
    %cst_24 = arith.constant 0.000000e+00 : f32
    %53 = vector.broadcast %cst_24 : f32 to vector<16x16xf32>
    %54 = arith.select %2, %52, %53 : vector<16x16xi1>, vector<16x16xf32>
    %cst_25 = arith.constant dense<0.000000e+00> : vector<16xf32>
    %55 = vector.multi_reduction <add>, %54, %cst_25 [1] : vector<16x16xf32> to vector<16xf32>
    %56 = vector.shape_cast %55 : vector<16xf32> to vector<16x1xf32>
    %cst_26 = arith.constant 1.000000e-30 : f32
    %57 = vector.broadcast %cst_26 : f32 to vector<16x1xf32>
    %58 = arith.maximumf %56, %57 : vector<16x1xf32>
    %59 = vector.broadcast %58 : vector<16x1xf32> to vector<16x16xf32>
    %60 = arith.divf %54, %59 : vector<16x16xf32>
    %c128_i32_27 = arith.constant 128 : i32
    %61 = vector.broadcast %c128_i32_27 : i32 to vector<16x256xi32>
    %62 = arith.cmpi sge, %15, %61 : vector<16x256xi32>
    %c256_i32 = arith.constant 256 : i32
    %63 = vector.broadcast %c256_i32 : i32 to vector<16x256xi32>
    %64 = arith.cmpi slt, %15, %63 : vector<16x256xi32>
    %65 = arith.andi %62, %64 : vector<16x256xi1>
    %cst_28 = arith.constant 0.000000e+00 : f32
    %66 = vector.broadcast %cst_28 : f32 to vector<16x256xf32>
    %67 = arith.select %65, %14, %66 : vector<16x256xi1>, vector<16x256xf32>
    %cst_29 = arith.constant dense<0.000000e+00> : vector<16x256xf32>
    %68 = tpu.matmul %60, %67, %cst_29 {dimension_numbers = #tpu.dot_dimension_numbers<[1], [0], [0], [1], [0, 0, 1, 1], [], []>} : vector<16x16xf32>, vector<16x256xf32>, vector<16x256xf32> -> vector<16x256xf32>
    %69 = arith.addf %42, %68 : vector<16x256xf32>
    %cst_30 = arith.constant 0.000000e+00 : f32
    %70 = vector.broadcast %cst_30 : f32 to vector<16x256xf32>
    %71 = arith.maximumf %69, %70 : vector<16x256xf32>
    %c0_31 = arith.constant 0 : index
    %c0_32 = arith.constant 0 : index
    %72 = vector.load %arg6[%c0_31, %c0_32] : memref<256x768xf32, #tpu.memory_space<vmem>>, vector<256x768xf32>
    %cst_33 = arith.constant dense<0.000000e+00> : vector<16x768xf32>
    %73 = tpu.matmul %71, %72, %cst_33 {dimension_numbers = #tpu.dot_dimension_numbers<[1], [0], [0], [1], [0, 0, 1, 1], [], []>} : vector<16x256xf32>, vector<256x768xf32>, vector<16x768xf32> -> vector<16x768xf32>
    %c0_34 = arith.constant 0 : index
    %c0_35 = arith.constant 0 : index
    %74 = vector.load %arg7[%c0_34, %c0_35] : memref<1x768xf32, #tpu.memory_space<vmem>>, vector<1x768xf32>
    %75 = vector.broadcast %74 : vector<1x768xf32> to vector<16x768xf32>
    %76 = arith.addf %73, %75 : vector<16x768xf32>
    %c0_36 = arith.constant 0 : index
    %c0_37 = arith.constant 0 : index
    %77 = vector.load %arg8[%c0_36, %c0_37] : memref<256x256xf32, #tpu.memory_space<vmem>>, vector<256x256xf32>
    %cst_38 = arith.constant dense<0.000000e+00> : vector<16x256xf32>
    %78 = tpu.matmul %71, %77, %cst_38 {dimension_numbers = #tpu.dot_dimension_numbers<[1], [0], [0], [1], [0, 0, 1, 1], [], []>} : vector<16x256xf32>, vector<256x256xf32>, vector<16x256xf32> -> vector<16x256xf32>
    %c0_39 = arith.constant 0 : index
    %c0_40 = arith.constant 0 : index
    %79 = vector.load %arg9[%c0_39, %c0_40] : memref<1x256xf32, #tpu.memory_space<vmem>>, vector<1x256xf32>
    %80 = vector.broadcast %79 : vector<1x256xf32> to vector<16x256xf32>
    %81 = arith.addf %78, %80 : vector<16x256xf32>
    %82 = vector.extract_strided_slice %76 {offsets = [0, 512], sizes = [16, 256], strides = [1, 1]} : vector<16x768xf32> to vector<16x256xf32>
    %83 = tpu.iota {dimensions = array<i32: 1>} : vector<16x256xi32>
    %84 = vector.extract_strided_slice %76 {offsets = [0, 0], sizes = [16, 128], strides = [1, 1]} : vector<16x768xf32> to vector<16x128xf32>
    %85 = vector.extract_strided_slice %76 {offsets = [0, 256], sizes = [16, 128], strides = [1, 1]} : vector<16x768xf32> to vector<16x128xf32>
    %cst_41 = arith.constant dense<0.000000e+00> : vector<16x16xf32>
    %86 = tpu.matmul %84, %85, %cst_41 {dimension_numbers = #tpu.dot_dimension_numbers<[1], [1], [0], [0], [0, 0, 1, 0], [], []>} : vector<16x128xf32>, vector<16x128xf32>, vector<16x16xf32> -> vector<16x16xf32>
    %cst_42 = arith.constant -1.000000e+30 : f32
    %87 = vector.broadcast %cst_42 : f32 to vector<16x16xf32>
    %88 = arith.select %2, %86, %87 : vector<16x16xi1>, vector<16x16xf32>
    %cst_43 = arith.constant dense<0xFF800000> : vector<16xf32>
    %89 = vector.multi_reduction <maximumf>, %88, %cst_43 [1] : vector<16x16xf32> to vector<16xf32>
    %90 = vector.shape_cast %89 : vector<16xf32> to vector<16x1xf32>
    %91 = vector.broadcast %90 : vector<16x1xf32> to vector<16x16xf32>
    %92 = arith.subf %88, %91 : vector<16x16xf32>
    %93 = math.exp %92 : vector<16x16xf32>
    %cst_44 = arith.constant 0.000000e+00 : f32
    %94 = vector.broadcast %cst_44 : f32 to vector<16x16xf32>
    %95 = arith.select %2, %93, %94 : vector<16x16xi1>, vector<16x16xf32>
    %cst_45 = arith.constant dense<0.000000e+00> : vector<16xf32>
    %96 = vector.multi_reduction <add>, %95, %cst_45 [1] : vector<16x16xf32> to vector<16xf32>
    %97 = vector.shape_cast %96 : vector<16xf32> to vector<16x1xf32>
    %cst_46 = arith.constant 1.000000e-30 : f32
    %98 = vector.broadcast %cst_46 : f32 to vector<16x1xf32>
    %99 = arith.maximumf %97, %98 : vector<16x1xf32>
    %100 = vector.broadcast %99 : vector<16x1xf32> to vector<16x16xf32>
    %101 = arith.divf %95, %100 : vector<16x16xf32>
    %c0_i32_47 = arith.constant 0 : i32
    %102 = vector.broadcast %c0_i32_47 : i32 to vector<16x256xi32>
    %103 = arith.cmpi sge, %83, %102 : vector<16x256xi32>
    %c128_i32_48 = arith.constant 128 : i32
    %104 = vector.broadcast %c128_i32_48 : i32 to vector<16x256xi32>
    %105 = arith.cmpi slt, %83, %104 : vector<16x256xi32>
    %106 = arith.andi %103, %105 : vector<16x256xi1>
    %cst_49 = arith.constant 0.000000e+00 : f32
    %107 = vector.broadcast %cst_49 : f32 to vector<16x256xf32>
    %108 = arith.select %106, %82, %107 : vector<16x256xi1>, vector<16x256xf32>
    %cst_50 = arith.constant dense<0.000000e+00> : vector<16x256xf32>
    %109 = tpu.matmul %101, %108, %cst_50 {dimension_numbers = #tpu.dot_dimension_numbers<[1], [0], [0], [1], [0, 0, 1, 1], [], []>} : vector<16x16xf32>, vector<16x256xf32>, vector<16x256xf32> -> vector<16x256xf32>
    %110 = arith.addf %81, %109 : vector<16x256xf32>
    %111 = vector.extract_strided_slice %76 {offsets = [0, 128], sizes = [16, 128], strides = [1, 1]} : vector<16x768xf32> to vector<16x128xf32>
    %112 = vector.extract_strided_slice %76 {offsets = [0, 384], sizes = [16, 128], strides = [1, 1]} : vector<16x768xf32> to vector<16x128xf32>
    %cst_51 = arith.constant dense<0.000000e+00> : vector<16x16xf32>
    %113 = tpu.matmul %111, %112, %cst_51 {dimension_numbers = #tpu.dot_dimension_numbers<[1], [1], [0], [0], [0, 0, 1, 0], [], []>} : vector<16x128xf32>, vector<16x128xf32>, vector<16x16xf32> -> vector<16x16xf32>
    %cst_52 = arith.constant -1.000000e+30 : f32
    %114 = vector.broadcast %cst_52 : f32 to vector<16x16xf32>
    %115 = arith.select %2, %113, %114 : vector<16x16xi1>, vector<16x16xf32>
    %cst_53 = arith.constant dense<0xFF800000> : vector<16xf32>
    %116 = vector.multi_reduction <maximumf>, %115, %cst_53 [1] : vector<16x16xf32> to vector<16xf32>
    %117 = vector.shape_cast %116 : vector<16xf32> to vector<16x1xf32>
    %118 = vector.broadcast %117 : vector<16x1xf32> to vector<16x16xf32>
    %119 = arith.subf %115, %118 : vector<16x16xf32>
    %120 = math.exp %119 : vector<16x16xf32>
    %cst_54 = arith.constant 0.000000e+00 : f32
    %121 = vector.broadcast %cst_54 : f32 to vector<16x16xf32>
    %122 = arith.select %2, %120, %121 : vector<16x16xi1>, vector<16x16xf32>
    %cst_55 = arith.constant dense<0.000000e+00> : vector<16xf32>
    %123 = vector.multi_reduction <add>, %122, %cst_55 [1] : vector<16x16xf32> to vector<16xf32>
    %124 = vector.shape_cast %123 : vector<16xf32> to vector<16x1xf32>
    %cst_56 = arith.constant 1.000000e-30 : f32
    %125 = vector.broadcast %cst_56 : f32 to vector<16x1xf32>
    %126 = arith.maximumf %124, %125 : vector<16x1xf32>
    %127 = vector.broadcast %126 : vector<16x1xf32> to vector<16x16xf32>
    %128 = arith.divf %122, %127 : vector<16x16xf32>
    %c128_i32_57 = arith.constant 128 : i32
    %129 = vector.broadcast %c128_i32_57 : i32 to vector<16x256xi32>
    %130 = arith.cmpi sge, %83, %129 : vector<16x256xi32>
    %c256_i32_58 = arith.constant 256 : i32
    %131 = vector.broadcast %c256_i32_58 : i32 to vector<16x256xi32>
    %132 = arith.cmpi slt, %83, %131 : vector<16x256xi32>
    %133 = arith.andi %130, %132 : vector<16x256xi1>
    %cst_59 = arith.constant 0.000000e+00 : f32
    %134 = vector.broadcast %cst_59 : f32 to vector<16x256xf32>
    %135 = arith.select %133, %82, %134 : vector<16x256xi1>, vector<16x256xf32>
    %cst_60 = arith.constant dense<0.000000e+00> : vector<16x256xf32>
    %136 = tpu.matmul %128, %135, %cst_60 {dimension_numbers = #tpu.dot_dimension_numbers<[1], [0], [0], [1], [0, 0, 1, 1], [], []>} : vector<16x16xf32>, vector<16x256xf32>, vector<16x256xf32> -> vector<16x256xf32>
    %137 = arith.addf %110, %136 : vector<16x256xf32>
    %cst_61 = arith.constant 0.000000e+00 : f32
    %138 = vector.broadcast %cst_61 : f32 to vector<16x256xf32>
    %139 = arith.maximumf %137, %138 : vector<16x256xf32>
    %c0_62 = arith.constant 0 : index
    %c0_63 = arith.constant 0 : index
    %140 = vector.load %arg10[%c0_62, %c0_63] : memref<256x96xf32, #tpu.memory_space<vmem>>, vector<256x96xf32>
    %cst_64 = arith.constant dense<0.000000e+00> : vector<16x96xf32>
    %141 = tpu.matmul %139, %140, %cst_64 {dimension_numbers = #tpu.dot_dimension_numbers<[1], [0], [0], [1], [0, 0, 1, 1], [], []>} : vector<16x256xf32>, vector<256x96xf32>, vector<16x96xf32> -> vector<16x96xf32>
    %c0_65 = arith.constant 0 : index
    %c0_66 = arith.constant 0 : index
    %142 = vector.load %arg11[%c0_65, %c0_66] : memref<1x96xf32, #tpu.memory_space<vmem>>, vector<1x96xf32>
    %143 = vector.broadcast %142 : vector<1x96xf32> to vector<16x96xf32>
    %144 = arith.addf %141, %143 : vector<16x96xf32>
    %c0_67 = arith.constant 0 : index
    %c0_68 = arith.constant 0 : index
    %145 = vector.load %arg12[%c0_67, %c0_68] : memref<256x32xf32, #tpu.memory_space<vmem>>, vector<256x32xf32>
    %cst_69 = arith.constant dense<0.000000e+00> : vector<16x32xf32>
    %146 = tpu.matmul %139, %145, %cst_69 {dimension_numbers = #tpu.dot_dimension_numbers<[1], [0], [0], [1], [0, 0, 1, 1], [], []>} : vector<16x256xf32>, vector<256x32xf32>, vector<16x32xf32> -> vector<16x32xf32>
    %c0_70 = arith.constant 0 : index
    %c0_71 = arith.constant 0 : index
    %147 = vector.load %arg13[%c0_70, %c0_71] : memref<1x32xf32, #tpu.memory_space<vmem>>, vector<1x32xf32>
    %148 = vector.broadcast %147 : vector<1x32xf32> to vector<16x32xf32>
    %149 = arith.addf %146, %148 : vector<16x32xf32>
    %150 = vector.extract_strided_slice %144 {offsets = [0, 64], sizes = [16, 32], strides = [1, 1]} : vector<16x96xf32> to vector<16x32xf32>
    %151 = tpu.iota {dimensions = array<i32: 1>} : vector<16x32xi32>
    %152 = vector.extract_strided_slice %144 {offsets = [0, 0], sizes = [16, 16], strides = [1, 1]} : vector<16x96xf32> to vector<16x16xf32>
    %153 = vector.extract_strided_slice %144 {offsets = [0, 32], sizes = [16, 16], strides = [1, 1]} : vector<16x96xf32> to vector<16x16xf32>
    %cst_72 = arith.constant dense<0.000000e+00> : vector<16x16xf32>
    %154 = tpu.matmul %152, %153, %cst_72 {dimension_numbers = #tpu.dot_dimension_numbers<[1], [1], [0], [0], [0, 0, 1, 0], [], []>} : vector<16x16xf32>, vector<16x16xf32>, vector<16x16xf32> -> vector<16x16xf32>
    %cst_73 = arith.constant -1.000000e+30 : f32
    %155 = vector.broadcast %cst_73 : f32 to vector<16x16xf32>
    %156 = arith.select %2, %154, %155 : vector<16x16xi1>, vector<16x16xf32>
    %cst_74 = arith.constant dense<0xFF800000> : vector<16xf32>
    %157 = vector.multi_reduction <maximumf>, %156, %cst_74 [1] : vector<16x16xf32> to vector<16xf32>
    %158 = vector.shape_cast %157 : vector<16xf32> to vector<16x1xf32>
    %159 = vector.broadcast %158 : vector<16x1xf32> to vector<16x16xf32>
    %160 = arith.subf %156, %159 : vector<16x16xf32>
    %161 = math.exp %160 : vector<16x16xf32>
    %cst_75 = arith.constant 0.000000e+00 : f32
    %162 = vector.broadcast %cst_75 : f32 to vector<16x16xf32>
    %163 = arith.select %2, %161, %162 : vector<16x16xi1>, vector<16x16xf32>
    %cst_76 = arith.constant dense<0.000000e+00> : vector<16xf32>
    %164 = vector.multi_reduction <add>, %163, %cst_76 [1] : vector<16x16xf32> to vector<16xf32>
    %165 = vector.shape_cast %164 : vector<16xf32> to vector<16x1xf32>
    %cst_77 = arith.constant 1.000000e-30 : f32
    %166 = vector.broadcast %cst_77 : f32 to vector<16x1xf32>
    %167 = arith.maximumf %165, %166 : vector<16x1xf32>
    %168 = vector.broadcast %167 : vector<16x1xf32> to vector<16x16xf32>
    %169 = arith.divf %163, %168 : vector<16x16xf32>
    %c0_i32_78 = arith.constant 0 : i32
    %170 = vector.broadcast %c0_i32_78 : i32 to vector<16x32xi32>
    %171 = arith.cmpi sge, %151, %170 : vector<16x32xi32>
    %c16_i32 = arith.constant 16 : i32
    %172 = vector.broadcast %c16_i32 : i32 to vector<16x32xi32>
    %173 = arith.cmpi slt, %151, %172 : vector<16x32xi32>
    %174 = arith.andi %171, %173 : vector<16x32xi1>
    %cst_79 = arith.constant 0.000000e+00 : f32
    %175 = vector.broadcast %cst_79 : f32 to vector<16x32xf32>
    %176 = arith.select %174, %150, %175 : vector<16x32xi1>, vector<16x32xf32>
    %cst_80 = arith.constant dense<0.000000e+00> : vector<16x32xf32>
    %177 = tpu.matmul %169, %176, %cst_80 {dimension_numbers = #tpu.dot_dimension_numbers<[1], [0], [0], [1], [0, 0, 1, 1], [], []>} : vector<16x16xf32>, vector<16x32xf32>, vector<16x32xf32> -> vector<16x32xf32>
    %178 = arith.addf %149, %177 : vector<16x32xf32>
    %179 = vector.extract_strided_slice %144 {offsets = [0, 16], sizes = [16, 16], strides = [1, 1]} : vector<16x96xf32> to vector<16x16xf32>
    %180 = vector.extract_strided_slice %144 {offsets = [0, 48], sizes = [16, 16], strides = [1, 1]} : vector<16x96xf32> to vector<16x16xf32>
    %cst_81 = arith.constant dense<0.000000e+00> : vector<16x16xf32>
    %181 = tpu.matmul %179, %180, %cst_81 {dimension_numbers = #tpu.dot_dimension_numbers<[1], [1], [0], [0], [0, 0, 1, 0], [], []>} : vector<16x16xf32>, vector<16x16xf32>, vector<16x16xf32> -> vector<16x16xf32>
    %cst_82 = arith.constant -1.000000e+30 : f32
    %182 = vector.broadcast %cst_82 : f32 to vector<16x16xf32>
    %183 = arith.select %2, %181, %182 : vector<16x16xi1>, vector<16x16xf32>
    %cst_83 = arith.constant dense<0xFF800000> : vector<16xf32>
    %184 = vector.multi_reduction <maximumf>, %183, %cst_83 [1] : vector<16x16xf32> to vector<16xf32>
    %185 = vector.shape_cast %184 : vector<16xf32> to vector<16x1xf32>
    %186 = vector.broadcast %185 : vector<16x1xf32> to vector<16x16xf32>
    %187 = arith.subf %183, %186 : vector<16x16xf32>
    %188 = math.exp %187 : vector<16x16xf32>
    %cst_84 = arith.constant 0.000000e+00 : f32
    %189 = vector.broadcast %cst_84 : f32 to vector<16x16xf32>
    %190 = arith.select %2, %188, %189 : vector<16x16xi1>, vector<16x16xf32>
    %cst_85 = arith.constant dense<0.000000e+00> : vector<16xf32>
    %191 = vector.multi_reduction <add>, %190, %cst_85 [1] : vector<16x16xf32> to vector<16xf32>
    %192 = vector.shape_cast %191 : vector<16xf32> to vector<16x1xf32>
    %cst_86 = arith.constant 1.000000e-30 : f32
    %193 = vector.broadcast %cst_86 : f32 to vector<16x1xf32>
    %194 = arith.maximumf %192, %193 : vector<16x1xf32>
    %195 = vector.broadcast %194 : vector<16x1xf32> to vector<16x16xf32>
    %196 = arith.divf %190, %195 : vector<16x16xf32>
    %c16_i32_87 = arith.constant 16 : i32
    %197 = vector.broadcast %c16_i32_87 : i32 to vector<16x32xi32>
    %198 = arith.cmpi sge, %151, %197 : vector<16x32xi32>
    %c32_i32 = arith.constant 32 : i32
    %199 = vector.broadcast %c32_i32 : i32 to vector<16x32xi32>
    %200 = arith.cmpi slt, %151, %199 : vector<16x32xi32>
    %201 = arith.andi %198, %200 : vector<16x32xi1>
    %cst_88 = arith.constant 0.000000e+00 : f32
    %202 = vector.broadcast %cst_88 : f32 to vector<16x32xf32>
    %203 = arith.select %201, %150, %202 : vector<16x32xi1>, vector<16x32xf32>
    %cst_89 = arith.constant dense<0.000000e+00> : vector<16x32xf32>
    %204 = tpu.matmul %196, %203, %cst_89 {dimension_numbers = #tpu.dot_dimension_numbers<[1], [0], [0], [1], [0, 0, 1, 1], [], []>} : vector<16x16xf32>, vector<16x32xf32>, vector<16x32xf32> -> vector<16x32xf32>
    %205 = arith.addf %178, %204 : vector<16x32xf32>
    %206 = tpu.iota {dimensions = array<i32: 1>} : vector<16x32xi32>
    %cst_90 = arith.constant 0.000000e+00 : f32
    %207 = vector.broadcast %cst_90 : f32 to vector<16x32xf32>
    %208 = arith.maximumf %205, %207 : vector<16x32xf32>
    %209 = math.absf %205 : vector<16x32xf32>
    %cst_91 = arith.constant 0.000000e+00 : f32
    %210 = vector.broadcast %cst_91 : f32 to vector<16x32xf32>
    %211 = arith.subf %210, %209 : vector<16x32xf32>
    %212 = math.exp %211 : vector<16x32xf32>
    %cst_92 = arith.constant 1.000000e+00 : f32
    %213 = vector.broadcast %cst_92 : f32 to vector<16x32xf32>
    %214 = arith.addf %213, %212 : vector<16x32xf32>
    %215 = math.log %214 : vector<16x32xf32>
    %216 = arith.addf %208, %215 : vector<16x32xf32>
    %cst_93 = arith.constant 1.000000e-07 : f32
    %217 = vector.broadcast %cst_93 : f32 to vector<16x32xf32>
    %218 = arith.addf %216, %217 : vector<16x32xf32>
    %c16_i32_94 = arith.constant 16 : i32
    %219 = vector.broadcast %c16_i32_94 : i32 to vector<16x32xi32>
    %220 = arith.cmpi slt, %206, %219 : vector<16x32xi32>
    %221 = arith.select %220, %205, %218 : vector<16x32xi1>, vector<16x32xf32>
    %c0_95 = arith.constant 0 : index
    %c0_96 = arith.constant 0 : index
    %222 = vector.load %arg14[%c0_95, %c0_96] : memref<16x32xf32, #tpu.memory_space<vmem>>, vector<16x32xf32>
    tpu.vector_store %arg14[%c0_95, %c0_96], %221 {strides = array<i32>} : memref<16x32xf32, #tpu.memory_space<vmem>>, vector<16x32xf32>,
    return
  }
}

</mosaic_0001>

<bundles_post_ra>
// kernel: tpu_custom_call.1
= control target key start
LH: loop header
LB: loop body
LE: loop exit
PB: predicated region body
PF: predicated region fallthrough
CT: control target
= control target key end

     0   :  { %19 = vsyncpa [#allocation3], 0  ;;  %s3396_s0 = inlined_call_operand.hbm [shape: f32[16,32], index: 0, kind: input, shape index: {}]   ;;  %s3397_s1 = inlined_call_operand.hbm [shape: f32[16,16], index: 1, kind: input, shape index: {}]   ;;  %s3398_s2 = inlined_call_operand.vmem [shape: f32[32,768], index: 2, kind: input, shape index: {}]   ;;  %s3399_s3 = inlined_call_operand.hbm [shape: f32[1,768], index: 3, kind: input, shape index: {}]   ;;  %s3400_s4 = inlined_call_operand.hbm [shape: f32[32,256], index: 4, kind: input, shape index: {}]   ;;  %s3401_s5 = inlined_call_operand.hbm [shape: f32[1,256], index: 5, kind: input, shape index: {}]   ;;  %s3402_s6 = inlined_call_operand.hbm [shape: f32[256,768], index: 6, kind: input, shape index: {}]   ;;  %s3403_s7 = inlined_call_operand.hbm [shape: f32[1,768], index: 7, kind: input, shape index: {}]   ;;  %s3404_s8 = inlined_call_operand.vmem [shape: f32[256,256], index: 8, kind: input, shape index: {}]   ;;  %s3405_s9 = inlined_call_operand.vmem [shape: f32[1,256], index: 9, kind: input, shape index: {}]   ;;  %s3406_s10 = inlined_call_operand.vmem [shape: f32[256,96], index: 10, kind: input, shape index: {}]   ;;  %s3407_s11 = inlined_call_operand.vmem [shape: f32[1,96], index: 11, kind: input, shape index: {}]   ;;  %s3408_s12 = inlined_call_operand.vmem [shape: f32[256,32], index: 12, kind: input, shape index: {}]   ;;  %s3409_s13 = inlined_call_operand.vmem [shape: f32[1,32], index: 13, kind: input, shape index: {}]   ;;  %s3410_s14 = inlined_call_operand.hbm [shape: f32[16,32], index: 14, kind: output, shape index: {}]  }
   0x1   :  { %20 = vsyncpa [#allocation6], 0 }
   0x2   :  { %21 = vsyncpa [#allocation9], 0 }
   0x3   :  { %22 = vsyncpa [#allocation12], 0 }
   0x4   :  { %23 = vsyncpa [#allocation4], 0  ;;  %s41_s15 = sshll.u32 %s3397_s1, 4  ;;  %s2414_s16 = smov [#allocation5]   ;;  %s42_s15 = int_to_ptr.hbm [resolvable:$true] %s41_s15 }
   0x5   :  { %s43_s17 = sshll.u32 %s2414_s16, 4  ;;  %s67_s20 = sshll.u32 %s3400_s4, 4  ;;  %s44_s17 = int_to_ptr.vmem [resolvable:$true] %s43_s17  ;;  %s68_s20 = int_to_ptr.hbm [resolvable:$true] %s67_s20 }
   0x6   :  { %s3411_s21 = smov 128   ;;  %s2416_s22 = smov 8  }
   0x7   :  { %49 = dma.hbm_to_vmem [thread:$0]  %s42_s15, 256, %s44_s17, [#allocation6], %s3411_s21, %s3411_s21, %s2416_s22  }
   0x8   :  { %s2417_s23 = smov [#allocation8]   ;;  %s2418_s25 = smov 256  }
   0x9   :  { %s69_s24 = sshll.u32 %s2417_s23, 4  ;;  %s2419_s1 = smov 16   ;;  %s70_s24 = int_to_ptr.vmem [resolvable:$true] %s69_s24 }
   0xa   :  { %75 = dma.hbm_to_vmem [thread:$0]  %s68_s20, 1024, %s70_s24, [#allocation9], %s2418_s25, %s2418_s25, %s2419_s1  }
   0xb   :  { %s91_s28 = sshll.u32 %s3402_s6, 4  ;;  %s2420_s29 = smov [#allocation11]   ;;  %s92_s28 = int_to_ptr.hbm [resolvable:$true] %s91_s28 }
   0xc   :  { %s93_s4 = sshll.u32 %s2420_s29, 4  ;;  %s28_s18 = sshll.u32 %s3396_s0, 4  ;;  %s94_s4 = int_to_ptr.vmem [resolvable:$true] %s93_s4  ;;  %s29_s18 = int_to_ptr.hbm [resolvable:$true] %s28_s18 }
   0xd   :  { %s2421_s15 = smov 768   ;;  %s2422_s17 = smov 48  }
   0xe   :  { %99 = dma.hbm_to_vmem [thread:$0]  %s92_s28, 24576, %s94_s4, [#allocation12], %s2421_s15, %s2421_s15, %s2422_s17  }
   0xf   :  { %s2423_s19 = smov [#allocation2]   ;;  %s57_s24 = sshll.u32 %s3399_s3, 4  ;;  %s58_s24 = int_to_ptr.hbm [resolvable:$true] %s57_s24 }
  0x10   :  { %s30_s23 = sshll.u32 %s2423_s19, 4  ;;  %s3413_s6 = smov 128   ;;  %s31_s23 = int_to_ptr.vmem [resolvable:$true] %s30_s23 }
  0x11   :  { %36 = dma.hbm_to_vmem [thread:$0]  %s29_s18, 256, %s31_s23, [#allocation3], %s3413_s6, %s3413_s6, %s2416_s22  }
  0x12   :  { %s81_s0 = sshll.u32 %s3401_s5, 4  ;;  %s2424_s26 = smov [#allocation7]   ;;  %s82_s0 = int_to_ptr.hbm [resolvable:$true] %s81_s0 }
  0x13   :  { %s59_s27 = sshll.u32 %s2424_s26, 4  ;;  %s2425_s28 = smov [#allocation10]   ;;  %s60_s27 = int_to_ptr.vmem [resolvable:$true] %s59_s27 }
  0x14   :  { %62 = dma.hbm_to_vmem [thread:$0]  %s58_s24, 96, %s60_s27, [#allocation6]  }
  0x15   :  { %s83_s29 = sshll.u32 %s2425_s28, 4  ;;  %s105_s3 = sshll.u32 %s3403_s7, 4  ;;  %s84_s29 = int_to_ptr.vmem [resolvable:$true] %s83_s29  ;;  %s106_s3 = int_to_ptr.hbm [resolvable:$true] %s105_s3 }
  0x16   :  { %86 = dma.hbm_to_vmem [thread:$0]  %s82_s0, 32, %s84_s29, [#allocation9]  }
  0x17   :  { %s2426_s30 = smov [#allocation13]  }
  0x18   :  { %s107_s16 = sshll.u32 %s2426_s30, 4  ;;  %s108_s16 = int_to_ptr.vmem [resolvable:$true] %s107_s16 }
  0x19   :  { %110 = dma.hbm_to_vmem [thread:$0]  %s106_s3, 96, %s108_s16, [#allocation12]  }
  0x1a   :  { %2404 = dma.done.wait [#allocation3], 256  }
  0x1b   :  { %2405 = vsyncadd [#allocation3], 4294967040 }
  0x1c   :  { %2406 = dma.done.wait [#allocation6], 352  }
  0x1d   :  { %2407 = vsyncadd [#allocation6], 4294966944 }
  0x1e   :  { %2408 = dma.done.wait [#allocation9], 1056  }
  0x1f   :  { %2409 = vsyncadd [#allocation9], 4294966240 }
  0x20   :  { %2410 = dma.done.wait [#allocation12], 24672  }
  0x21   :  { %2411 = vsyncadd [#allocation12], 4294942624  ;;  %v177_v0 = vld [vmem:[%s3398_s2 + $0xa0] sm:$0xff]  ;;  %v178_v1 = vld [vmem:[%s3398_s2 + $0xa8] sm:$0xff]  ;;  %vm195_vm0 = vcmask 261120   ;;  %vm428_vm2 = vcmask 130048  }
  0x22   :  { %v171_v2 = vld [vmem:[%s3398_s2 + $0x70] sm:$0xff]  ;;  %260 = vmatpush.msra.mxu2 %v177_v0  ;;  %283 = vmatpush.msra.mxu3 %v178_v1  ;;  %v172_v3 = vld [vmem:[%s3398_s2 + $0x78] sm:$0xff]  ;;  %v165_v4 = vld [vmem:[%s3398_s2 + $0x40] sm:$0xff]  ;;  %s2429_s29 = smov 80   ;;  %s2430_s4 = smov 96  }
  0x23   :  { %v166_v5 = vld [vmem:[%s3398_s2 + $0x48] sm:$0xff]  ;;  %v159_v6 = vld [vmem:[%s3398_s2 + $0x10] sm:$0xff]  ;;  %v176_v8 = vld [vmem:[%s3398_s2 + $0x98] sm:$0xff]  ;;  %s2071_s18 = sshll.u32 %s3410_s14, 4  ;;  %s2072_s18 = int_to_ptr.hbm [resolvable:$true] %s2071_s18 }
  0x24   :  { %261 = vmatpush.msra.mxu2 %v171_v2  ;;  %284 = vmatpush.msra.mxu3 %v172_v3  ;;  %v175_v7 = vld [vmem:[%s3398_s2 + $0x90] sm:$0xff]  ;;  %v160_v9 = vld [vmem:[%s3398_s2 + $0x18] sm:$0xff]  ;;  %v169_v10 = vld [vmem:[%s3398_s2 + $0x60] sm:$0xff] }
  0x25   :  { %214 = vmatpush.msra.mxu0 %v175_v7  ;;  %237 = vmatpush.msra.mxu1 %v176_v8  ;;  %v170_v11 = vld [vmem:[%s3398_s2 + $0x68] sm:$0xff]  ;;  %v2571_v12 = vld [vmem:[#allocation2] sm:$0xff]  ;;  %v163_v13 = vld [vmem:[%s3398_s2 + $0x30] sm:$0xff] }
  0x26   :  { %262 = vmatpush.msra.mxu2 %v165_v4  ;;  %285 = vmatpush.msra.mxu3 %v166_v5  ;;  %v164_v14 = vld [vmem:[%s3398_s2 + $0x38] sm:$0xff]  ;;  %v157_v16 = vld [vmem:[%s3398_s2] sm:$0xff]  ;;  %v158_v17 = vld [vmem:[%s3398_s2 + $0x8] sm:$0xff] }
  0x27   :  { %215 = vmatpush.msra.mxu0 %v169_v10  ;;  %238 = vmatpush.msra.mxu1 %v170_v11  ;;  %v347_v15 = vld [vmem:[#allocation8 + $0x38] sm:$0xff]  ;;  %v179_v18 = vld [vmem:[%s3398_s2 + $0xb0] sm:$0xff]  ;;  %v2599_v22 = vld [vmem:[#allocation2 + $0x8] sm:$0xff] }
  0x28   :  { %263 = vmatpush.msra.mxu2 %v159_v6  ;;  %286 = vmatpush.msra.mxu3 %v160_v9  ;;  %v345_v19 = vld [vmem:[#allocation8 + $0x28] sm:$0xff]  ;;  %v173_v20 = vld [vmem:[%s3398_s2 + $0x80] sm:$0xff]  ;;  %v180_v26 = vld [vmem:[%s3398_s2 + $0xb8] sm:$0xff] }
  0x29   :  { %2091 = vmatmul.msk.f32.vlgmr.msra.gmra.mxu2 %vm195_vm0, %v2571_v12  ;;  %2093 = vmatmul.msk.f32.vlgmr.msra.gmra.mxu3 %vm195_vm0, %v2571_v12  ;;  %v343_v21 = vld [vmem:[#allocation8 + $0x18] sm:$0xff]  ;;  %v167_v23 = vld [vmem:[%s3398_s2 + $0x50] sm:$0xff]  ;;  %v174_v27 = vld [vmem:[%s3398_s2 + $0x88] sm:$0xff] }
  0x2a   :  { %216 = vmatpush.msra.mxu0 %v163_v13  ;;  %239 = vmatpush.msra.mxu1 %v164_v14  ;;  %v161_v24 = vld [vmem:[%s3398_s2 + $0x20] sm:$0xff]  ;;  %v341_v25 = vld [vmem:[#allocation8 + $0x8] sm:$0xff]  ;;  %v168_v28 = vld [vmem:[%s3398_s2 + $0x58] sm:$0xff] }
  0x2b   :  { %389 = vmatpush.msrb.mxu3 %v347_v15  ;;  %v162_v30 = vld [vmem:[%s3398_s2 + $0x28] sm:$0xff]  ;;  %v2637_v33 = vld [vmem:[#allocation7] sm:$0x3f]  ;;  %v2648_v57 = vld [vmem:[#allocation5] sm:$0xff] }
  0x2c   :  { %217 = vmatpush.msra.mxu0 %v157_v16  ;;  %240 = vmatpush.msra.mxu1 %v158_v17  ;;  %v186_v34 = vperm.slane %v2637_v33, 3  ;;  %v185_v36 = vperm.slane %v2637_v33, 2  ;;  %v183_v42 = vperm.slane %v2637_v33, 0  ;;  %v184_v43 = vperm.slane %v2637_v33, 1  ;;  %v2656_v62 = vld [vmem:[#allocation5 + $0x8] sm:$0xff] }
  0x2d   :  { %2087 = vmatmul.msk.f32.vlgmr.msra.gmra.mxu0 %vm195_vm0, %v2571_v12  ;;  %2089 = vmatmul.msk.f32.vlgmr.msra.gmra.mxu1 %vm195_vm0, %v2571_v12  ;;  %v187_v50 = vperm.slane %v2637_v33, 4  ;;  %vm153_vm1 = vcmp.gt.f32.partialorder %v2648_v57, 0.5  ;;  %vm154_vm3 = vcmp.gt.f32.partialorder %v2656_v62, 0.5  ;;  %v346_v8 = vld [vmem:[#allocation8 + $0x30] sm:$0xff] }
  0x2e   :  { %306 = vmatpush.msrb.mxu0 %v179_v18  ;;  %390 = vmatpush.msrb.mxu3 %v345_v19 }
  0x2f   :  { %329 = vmatpush.msrb.mxu1 %v180_v26  ;;  %366 = vmatpush.msrb.mxu2 %v346_v8 }
  0x30   :  { %307 = vmatpush.msrb.mxu0 %v173_v20  ;;  %391 = vmatpush.msrb.mxu3 %v343_v21 }
  0x31   :  { %2092 = vmatmul.msk.f32.gmra.mxu2 %vm195_vm0, %v2599_v22  ;;  %2094 = vmatmul.msk.f32.gmra.mxu3 %vm195_vm0, %v2599_v22 }
  0x32   :  { %308 = vmatpush.msrb.mxu0 %v167_v23  ;;  %392 = vmatpush.msrb.mxu3 %v341_v25 }
  0x33   :  { %330 = vmatpush.msrb.mxu1 %v174_v27 }
  0x34   :  { %309 = vmatpush.msrb.mxu0 %v161_v24 }
  0x35   :  { %2088 = vmatmul.msk.f32.gmra.mxu0 %vm195_vm0, %v2599_v22  ;;  %2090 = vmatmul.msk.f32.gmra.mxu1 %vm195_vm0, %v2599_v22 }
  0x36   :  { %331 = vmatpush.msrb.mxu1 %v168_v28 }
  0x38   :  { %332 = vmatpush.msrb.mxu1 %v162_v30 }
  0x39   :  { %2101 = vmatmul.msk.f32.vlgmr.msrb.gmra.mxu3 %vm195_vm0, %v2571_v12 }
  0x3d   :  { %2095 = vmatmul.msk.f32.vlgmr.msrb.gmra.mxu0 %vm195_vm0, %v2571_v12  ;;  %2097 = vmatmul.msk.f32.vlgmr.msrb.gmra.mxu1 %vm195_vm0, %v2571_v12 }
  0x41   :  { %2102 = vmatmul.msk.f32.gmra.mxu3 %vm195_vm0, %v2599_v22 }
  0x45   :  { %2096 = vmatmul.msk.f32.gmra.mxu0 %vm195_vm0, %v2599_v22  ;;  %2098 = vmatmul.msk.f32.gmra.mxu1 %vm195_vm0, %v2599_v22 }
  0xaa   :  { %v219_v29 = vpop.f32.mrf.mxu0  ;;  %v242_v41 = vpop.f32.mrf.mxu1 }
  0xab   :  { %v220_v46 = vadd.f32 %v219_v29, %v183_v42  ;;  %v243_v47 = vadd.f32 %v242_v41, %v184_v43  ;;  %v2427_v41 = vmov 0.0  }
  0xac   :  { %v265_v31 = vpop.f32.mrf.mxu2  ;;  %v288_v32 = vpop.f32.mrf.mxu3 }
  0xad   :  { %v266_v44 = vadd.f32 %v265_v31, %v185_v36  ;;  %v289_v45 = vadd.f32 %v288_v32, %v186_v34 }
  0xb2   :  { %v222_v35 = vpop.f32.mrf.mxu0  ;;  %v245_v49 = vpop.f32.mrf.mxu1 }
  0xb3   :  { %v223_v51 = vadd.f32 %v222_v35, %v183_v42  ;;  %v246_v52 = vadd.f32 %v245_v49, %v184_v43 }
  0xb4   :  { %v268_v37 = vpop.f32.mrf.mxu2  ;;  %v291_v38 = vpop.f32.mrf.mxu3 }
  0xb5   :  { %v269_v39 = vadd.f32 %v268_v37, %v185_v36  ;;  %v292_v40 = vadd.f32 %v291_v38, %v186_v34  ;;  %v344_v36 = vld [vmem:[#allocation8 + $0x20] sm:$0xff]  ;;  %v342_v37 = vld [vmem:[#allocation8 + $0x10] sm:$0xff] }
  0xb6   :  { %367 = vmatpush.msrb.mxu2 %v344_v36  ;;  %v340_v38 = vld [vmem:[#allocation8] sm:$0xff]  ;;  %v875_v36 = vld [vmem:[#allocation11 + $0x5a8] sm:$0xff] }
  0xb7   :  { %417 = vmatpush.xpose.msra.mxu0 %v269_v39  ;;  %561 = vmatpush.xpose.msra.mxu3 %v292_v40  ;;  %v188_v40 = vperm.slane %v2637_v33, 5 }
  0xb8   :  { %368 = vmatpush.msrb.mxu2 %v342_v37  ;;  %v868_v37 = vld [vmem:[#allocation11 + $0x570] sm:$0xff] }
  0xba   :  { %v311_v48 = vpop.f32.mrf.mxu0  ;;  %369 = vmatpush.msrb.mxu2 %v340_v38  ;;  %v334_v39 = vpop.f32.mrf.mxu1 }
  0xbb   :  { %418 = vmatpush.xpose.msra.mxu0 %v266_v44  ;;  %562 = vmatpush.xpose.msra.mxu3 %v289_v45  ;;  %v312_v54 = vadd.f32 %v311_v48, %v187_v50  ;;  %v335_v43 = vadd.f32 %v334_v39, %v188_v40 }
  0xbc   :  { %v2646_v56 = vpop.f32.mrf.mxu3  ;;  %2099 = vmatmul.msk.f32.vlgmr.msrb.gmra.mxu2 %vm195_vm0, %v2571_v12 }
  0xbd   :  { %535 = vmatpush.msra.mxu2 %v2427_v41 }
  0xbe   :  { %419 = vmatmul.f32.vlgmr.msra.gmra.mxu0 %v220_v46  ;;  %563 = vmatmul.f32.vlgmr.msra.gmra.mxu3 %v243_v47 }
  0xbf   :  { %655 = vmatpush.msrb.mxu0 %v2427_v41 }
  0xc2   :  { %v314_v53 = vpop.f32.mrf.mxu0  ;;  %v337_v42 = vpop.f32.mrf.mxu1 }
  0xc3   :  { %v315_v55 = vadd.f32 %v314_v53, %v187_v50  ;;  %v338_v44 = vadd.f32 %v337_v42, %v188_v40  ;;  %v754_v40 = vld [vmem:[#allocation11 + $0x1e0] sm:$0xff]  ;;  %v755_v42 = vld [vmem:[#allocation11 + $0x1e8] sm:$0xff] }
  0xc4   :  { %v2650_v58 = vpop.f32.mrf.mxu3  ;;  %2100 = vmatmul.msk.f32.gmra.mxu2 %vm195_vm0, %v2599_v22 }
  0xc5   :  { %511 = vmatpush.msra.mxu1 %v315_v55 }
  0xc6   :  { %422 = vmatmul.f32.gmra.mxu0 %v223_v51  ;;  %566 = vmatmul.f32.gmra.mxu3 %v246_v52 }
  0xc7   :  { %512 = vmatpush.msra.mxu1 %v312_v54 }
  0xc9   :  { %677 = vmatpush.msrb.mxu1 %v338_v44 }
  0xcb   :  { %678 = vmatpush.msrb.mxu1 %v335_v43 }
 0x13b   :  { %v420_v59 = vpop.f32.mrf.mxu0 }
 0x13c   :  { %v426_v60 = vsel %vm153_vm1, %v420_v59, -1e+30 }
 0x13d   :  { %v429_v61 = vsel %vm428_vm2, %v426_v60, -inf }
 0x13e   :  { %430 = vmax.xlane.f32.xlu0 %v429_v61  ;;  %v785_v61 = vld [vmem:[#allocation11 + $0x2d8] sm:$0xff] }
 0x13f   :  { %946 = vmatpush.msra.mxu0 %v785_v61 }
 0x141   :  { %v564_v63 = vpop.f32.mrf.mxu3 }
 0x142   :  { %v570_v0 = vsel %vm153_vm1, %v564_v63, -1e+30  ;;  %v778_v63 = vld [vmem:[#allocation11 + $0x2a0] sm:$0xff] }
 0x143   :  { %v423_v1 = vpop.f32.mrf.mxu0  ;;  %v572_v2 = vsel %vm428_vm2, %v570_v0, -inf }
 0x144   :  { %v427_v3 = vsel %vm154_vm3, %v423_v1, -1e+30  ;;  %573 = vmax.xlane.f32.xlu1 %v572_v2  ;;  %v779_v2 = vld [vmem:[#allocation11 + $0x2a8] sm:$0xff] }
 0x145   :  { %v432_v4 = vsel %vm428_vm2, %v427_v3, -inf  ;;  %947 = vmatpush.msra.mxu0 %v779_v2  ;;  %v737_v2 = vld [vmem:[#allocation11 + $0x158] sm:$0xff] }
 0x146   :  { %433 = vmax.xlane.f32.xlu0 %v432_v4  ;;  %v772_v4 = vld [vmem:[#allocation11 + $0x270] sm:$0xff] }
 0x149   :  { %v567_v5 = vpop.f32.mrf.mxu3 }
 0x14a   :  { %v571_v6 = vsel %vm154_vm3, %v567_v5, -1e+30  ;;  %v773_v5 = vld [vmem:[#allocation11 + $0x278] sm:$0xff] }
 0x14b   :  { %v575_v7 = vsel %vm428_vm2, %v571_v6, -inf  ;;  %948 = vmatpush.msra.mxu0 %v773_v5 }
 0x14c   :  { %576 = vmax.xlane.f32.xlu1 %v575_v7 }
 0x1b1   :  { %v431_v9 = vpop.xlane.xlu0 %430 }
 0x1b2   :  { %v435_v10 = vsub.f32 %v426_v60, %v431_v9  ;;  %v784_v60 = vld [vmem:[#allocation11 + $0x2d0] sm:$0xff] }
 0x1b3   :  { %900 = vmatpush.msrb.mxu2 %v784_v60  ;;  %v743_v60 = vld [vmem:[#allocation11 + $0x188] sm:$0xff] }
 0x1b4   :  { %v437_v11 = vmul.f32 1.442695, %v435_v10 }
 0x1b5   :  { %901 = vmatpush.msrb.mxu2 %v778_v63  ;;  %v856_v63 = vld [vmem:[#allocation11 + $0x510] sm:$0xff] }
 0x1b6   :  { %2156 = vpow2.f32 %v437_v11 }
 0x1b7   :  { %v574_v13 = vpop.xlane.xlu1 %573  ;;  %902 = vmatpush.msrb.mxu2 %v772_v4  ;;  %v851_v4 = vld [vmem:[#allocation11 + $0x4e8] sm:$0xff] }
 0x1b8   :  { %v578_v14 = vsub.f32 %v570_v0, %v574_v13  ;;  %v880_v13 = vld [vmem:[#allocation11 + $0x5d0] sm:$0xff] }
 0x1b9   :  { %v434_v15 = vpop.xlane.xlu0 %433  ;;  %923 = vmatpush.msrb.mxu3 %v880_v13  ;;  %v725_v13 = vld [vmem:[#allocation11 + $0xf8] sm:$0xff] }
 0x1ba   :  { %v580_v16 = vmul.f32 1.442695, %v578_v14  ;;  %v436_v17 = vsub.f32 %v427_v3, %v434_v15 }
 0x1bc   :  { %v2157_v18 = vpop.eup %2156  ;;  %2158 = vpow2.f32 %v580_v16  ;;  %v439_v19 = vmul.f32 1.442695, %v436_v17  ;;  %v766_v17 = vld [vmem:[#allocation11 + $0x240] sm:$0xff] }
 0x1bd   :  { %v2670_v20 = vsel %vm153_vm1, %v2157_v18, 0.0  ;;  %v767_v18 = vld [vmem:[#allocation11 + $0x248] sm:$0xff]  ;;  %903 = vmatpush.msrb.mxu2 %v766_v17  ;;  %v712_v17 = vld [vmem:[#allocation11 + $0x90] sm:$0xff] }
 0x1be   :  { %2160 = vpow2.f32 %v439_v19  ;;  %v443_v21 = vsel %vm428_vm2, %v2670_v20, 0.0  ;;  %949 = vmatpush.msra.mxu0 %v767_v18  ;;  %v832_v18 = vld [vmem:[#allocation11 + $0x450] sm:$0xff] }
 0x1bf   :  { %v577_v23 = vpop.xlane.xlu1 %576  ;;  %444 = vadd.xlane.f32.xlu2 %v443_v21  ;;  %v881_v21 = vld [vmem:[#allocation11 + $0x5d8] sm:$0xff] }
 0x1c0   :  { %v579_v24 = vsub.f32 %v571_v6, %v577_v23  ;;  %v874_v23 = vld [vmem:[#allocation11 + $0x5a0] sm:$0xff] }
 0x1c1   :  { %924 = vmatpush.msrb.mxu3 %v874_v23  ;;  %v706_v23 = vld [vmem:[#allocation11 + $0x60] sm:$0xff] }
 0x1c2   :  { %v2159_v25 = vpop.eup %2158  ;;  %v582_v26 = vmul.f32 1.442695, %v579_v24 }
 0x1c3   :  { %v2676_v27 = vsel %vm153_vm1, %v2159_v25, 0.0  ;;  %925 = vmatpush.msrb.mxu3 %v868_v37  ;;  %v787_v37 = vld [vmem:[#allocation11 + $0x2e8] sm:$0xff] }
 0x1c4   :  { %v2161_v28 = vpop.eup %2160  ;;  %2162 = vpow2.f32 %v582_v26  ;;  %v586_v29 = vsel %vm428_vm2, %v2676_v27, 0.0  ;;  %v760_v26 = vld [vmem:[#allocation11 + $0x210] sm:$0xff] }
 0x1c5   :  { %587 = vadd.xlane.f32.xlu0 %v586_v29  ;;  %v2682_v30 = vsel %vm154_vm3, %v2161_v28, 0.0  ;;  %904 = vmatpush.msrb.mxu2 %v760_v26  ;;  %v827_v26 = vld [vmem:[#allocation11 + $0x428] sm:$0xff]  ;;  %v701_v29 = vld [vmem:[#allocation11 + $0x38] sm:$0xff] }
 0x1c6   :  { %v446_v31 = vsel %vm428_vm2, %v2682_v30, 0.0 }
 0x1c7   :  { %447 = vadd.xlane.f32.xlu2 %v446_v31  ;;  %905 = vmatpush.msrb.mxu2 %v754_v40  ;;  %v780_v40 = vld [vmem:[#allocation11 + $0x2b0] sm:$0xff] }
 0x1ca   :  { %v2163_v32 = vpop.eup %2162 }
 0x1cb   :  { %v2688_v34 = vsel %vm154_vm3, %v2163_v32, 0.0 }
 0x1cc   :  { %v589_v35 = vsel %vm428_vm2, %v2688_v34, 0.0 }
 0x1cd   :  { %590 = vadd.xlane.f32.xlu1 %v589_v35 }
 0x232   :  { %v445_v45 = vpop.xlane.xlu2 %444 }
 0x233   :  { %v449_v46 = vmax.f32 %v445_v45, 1e-30  ;;  %v869_v45 = vld [vmem:[#allocation11 + $0x578] sm:$0xff] }
 0x235   :  { %2164 = vrcp.f32 %v449_v46  ;;  %v462_v51 = vand.u32 2147483648, %v449_v46  ;;  %v460_v53 = vand.u32 2147483647, %v449_v46  ;;  %vm456_vm5 = vweird.f32 %v449_v46 }
 0x237   :  { %v463_v3 = vor.u32 1.1754944e-38, %v462_v51  ;;  %vm461_vm7 = vcmp.eq.f32.partialorder %v460_v53, 8.507059e+37  ;;  %v863_v51 = vld [vmem:[#allocation11 + $0x548] sm:$0xff] }
 0x238   :  { %v588_v12 = vpop.xlane.xlu0 %587 }
 0x239   :  { %v2699_v47 = vmax.f32 %v588_v12, 1e-30 }
 0x23a   :  { %v448_v22 = vpop.xlane.xlu2 %447 }
 0x23b   :  { %v2165_v48 = vpop.eup %2164  ;;  %2166 = vrcp.f32 %v2699_v47  ;;  %v2702_v49 = vmax.f32 %v448_v22, 1e-30  ;;  %v605_v9 = vand.u32 2147483648, %v2699_v47  ;;  %v603_v15 = vand.u32 2147483647, %v2699_v47  ;;  %v748_v22 = vld [vmem:[#allocation11 + $0x1b0] sm:$0xff] }
 0x23c   :  { %v452_v33 = vmul.f32 %v2165_v48, %v449_v46  ;;  %vm457_vm4 = vweird.f32 %v2165_v48  ;;  %vm599_vm9 = vweird.f32 %v2699_v47  ;;  %906 = vmatpush.msrb.mxu2 %v748_v22  ;;  %v768_v22 = vld [vmem:[#allocation11 + $0x250] sm:$0xff] }
 0x23d   :  { %2168 = vrcp.f32 %v2702_v49  ;;  %vm458_vm6 = vmor %vm456_vm5, %vm457_vm4  ;;  %v477_v25 = vand.u32 2147483648, %v2702_v49  ;;  %v606_v31 = vor.u32 1.1754944e-38, %v605_v9  ;;  %v475_v35 = vand.u32 2147483647, %v2702_v49  ;;  %v844_v9 = vld [vmem:[#allocation11 + $0x4b0] sm:$0xff] }
 0x23e   :  { %v453_v50 = vsub.f32 1.0, %v452_v33  ;;  %vm604_vm12 = vcmp.eq.f32.partialorder %v603_v15, 8.507059e+37  ;;  %vm471_vm13 = vweird.f32 %v2702_v49  ;;  %v838_v15 = vld [vmem:[#allocation11 + $0x480] sm:$0xff] }
 0x23f   :  { %vm476_vm15 = vcmp.eq.f32.partialorder %v475_v35, 8.507059e+37  ;;  %v695_v35 = vld [vmem:[#allocation11 + $0x8] sm:$0xff] }
 0x240   :  { %v454_v52 = vmul.f32 %v2165_v48, %v453_v50  ;;  %v591_v54 = vpop.xlane.xlu1 %590  ;;  %v862_v50 = vld [vmem:[#allocation11 + $0x540] sm:$0xff] }
 0x241   :  { %v2705_v55 = vpop.eup %2166  ;;  %v2707_v59 = vmax.f32 %v591_v54, 1e-30  ;;  %926 = vmatpush.msrb.mxu3 %v862_v50  ;;  %v762_v50 = vld [vmem:[#allocation11 + $0x220] sm:$0xff] }
 0x242   :  { %v455_v0 = vadd.f32 %v2165_v48, %v454_v52  ;;  %v595_v1 = vmul.f32 %v2705_v55, %v2699_v47  ;;  %vm600_vm8 = vweird.f32 %v2705_v55  ;;  %v478_v47 = vor.u32 1.1754944e-38, %v477_v25  ;;  %v707_v25 = vld [vmem:[#allocation11 + $0x68] sm:$0xff] }
 0x243   :  { %2170 = vrcp.f32 %v2707_v59  ;;  %v2712_v6 = vpop.eup %2168  ;;  %vm2730_vm10 = vmor %vm599_vm9, %vm600_vm8  ;;  %v618_v53 = vand.u32 2147483647, %v2707_v59  ;;  %vm614_vm5 = vweird.f32 %v2707_v59  ;;  %927 = vmatpush.msrb.mxu3 %v856_v63  ;;  %v876_v63 = vld [vmem:[#allocation11 + $0x5b0] sm:$0xff] }
 0x244   :  { %v596_v7 = vsub.f32 1.0, %v595_v1  ;;  %v459_v8 = vsel %vm458_vm6, %v2165_v48, %v455_v0  ;;  %v467_v10 = vmul.f32 %v2712_v6, %v2702_v49  ;;  %vm472_vm11 = vweird.f32 %v2712_v6  ;;  %v749_v48 = vld [vmem:[#allocation11 + $0x1b8] sm:$0xff]  ;;  %v736_v1 = vld [vmem:[#allocation11 + $0x150] sm:$0xff] }
 0x245   :  { %v464_v11 = vsel %vm461_vm7, %v463_v3, %v459_v8  ;;  %vm473_vm14 = vmor %vm471_vm13, %vm472_vm11  ;;  %v620_v49 = vand.u32 2147483648, %v2707_v59  ;;  %v857_v0 = vld [vmem:[#allocation11 + $0x518] sm:$0xff]  ;;  %vm619_vm7 = vcmp.eq.f32.partialorder %v618_v53, 8.507059e+37  ;;  %v731_v8 = vld [vmem:[#allocation11 + $0x128] sm:$0xff] }
 0x246   :  { %v597_v14 = vmul.f32 %v2705_v55, %v596_v7  ;;  %v465_v16 = vmul.f32 %v464_v11, %v2670_v20  ;;  %v468_v19 = vsub.f32 1.0, %v467_v10  ;;  %v761_v20 = vld [vmem:[#allocation11 + $0x218] sm:$0xff]  ;;  %v724_v10 = vld [vmem:[#allocation11 + $0xf0] sm:$0xff] }
 0x247   :  { %950 = vmatpush.msra.mxu0 %v761_v20  ;;  %v845_v11 = vld [vmem:[#allocation11 + $0x4b8] sm:$0xff]  ;;  %v700_v20 = vld [vmem:[#allocation11 + $0x30] sm:$0xff] }
 0x248   :  { %v598_v24 = vadd.f32 %v2705_v55, %v597_v14  ;;  %2103 = vmatmul.msk.f32.vlgmr.msra.gmra.mxu1 %vm428_vm2, %v465_v16  ;;  %2105 = vmatmul.msk.f32.vlgmr.msra.gmra.mxu2 %vm428_vm2, %v465_v16  ;;  %v469_v32 = vmul.f32 %v2712_v6, %v468_v19  ;;  %v718_v14 = vld [vmem:[#allocation11 + $0xc0] sm:$0xff]  ;;  %v719_v16 = vld [vmem:[#allocation11 + $0xc8] sm:$0xff]  ;;  %v713_v19 = vld [vmem:[#allocation11 + $0x98] sm:$0xff] }
 0x249   :  { %v2726_v28 = vpop.eup %2170  ;;  %969 = vmatpush.msra.mxu1 %v881_v21  ;;  %951 = vmatpush.msra.mxu0 %v755_v42  ;;  %v833_v21 = vld [vmem:[#allocation11 + $0x458] sm:$0xff]  ;;  %v756_v53 = vld [vmem:[#allocation11 + $0x1f0] sm:$0xff] }
 0x24a   :  { %v610_v38 = vmul.f32 %v2726_v28, %v2707_v59  ;;  %v602_v39 = vsel %vm2730_vm10, %v2705_v55, %v598_v24  ;;  %v470_v44 = vadd.f32 %v2712_v6, %v469_v32  ;;  %vm615_vm4 = vweird.f32 %v2726_v28  ;;  %v742_v55 = vld [vmem:[#allocation11 + $0x180] sm:$0xff]  ;;  %v821_v32 = vld [vmem:[#allocation11 + $0x3f8] sm:$0xff] }
 0x24b   :  { %v607_v43 = vsel %vm604_vm12, %v606_v31, %v602_v39  ;;  %970 = vmatpush.msra.mxu1 %v875_v36  ;;  %952 = vmatpush.msra.mxu0 %v749_v48  ;;  %vm616_vm6 = vmor %vm614_vm5, %vm615_vm4  ;;  %v850_v59 = vld [vmem:[#allocation11 + $0x4e0] sm:$0xff]  ;;  %v815_v39 = vld [vmem:[#allocation11 + $0x3c8] sm:$0xff] }
 0x24c   :  { %v611_v46 = vsub.f32 1.0, %v610_v38  ;;  %v2745_v12 = vmul.f32 %v607_v43, %v2676_v27  ;;  %v474_v33 = vsel %vm473_vm14, %v2712_v6, %v470_v44  ;;  %907 = vmatpush.msrb.mxu2 %v742_v55  ;;  %v730_v6 = vld [vmem:[#allocation11 + $0x120] sm:$0xff]  ;;  %928 = vmatpush.msrb.mxu3 %v850_v59  ;;  %v781_v42 = vld [vmem:[#allocation11 + $0x2b8] sm:$0xff]  ;;  %v808_v43 = vld [vmem:[#allocation11 + $0x390] sm:$0xff] }
 0x24d   :  { %v479_v27 = vsel %vm476_vm15, %v478_v47, %v474_v33  ;;  %971 = vmatpush.msra.mxu1 %v869_v45  ;;  %953 = vmatpush.msra.mxu0 %v743_v60  ;;  %v826_v24 = vld [vmem:[#allocation11 + $0x420] sm:$0xff]  ;;  %v809_v44 = vld [vmem:[#allocation11 + $0x398] sm:$0xff]  ;;  %v803_v47 = vld [vmem:[#allocation11 + $0x368] sm:$0xff] }
 0x24e   :  { %2107 = vmatmul.msk.f32.vlgmr.msrb.gmra.mxu0 %vm428_vm2, %v2745_v12  ;;  %v612_v52 = vmul.f32 %v2726_v28, %v611_v46  ;;  %v480_v54 = vmul.f32 %v479_v27, %v2682_v30  ;;  %v621_v30 = vor.u32 1.1754944e-38, %v620_v49  ;;  %908 = vmatpush.msrb.mxu2 %v736_v1  ;;  %v694_v31 = vld [vmem:[#allocation11] sm:$0xff]  ;;  %v775_v46 = vld [vmem:[#allocation11 + $0x288] sm:$0xff]  ;;  %v769_v48 = vld [vmem:[#allocation11 + $0x258] sm:$0xff] }
 0x24f   :  { %972 = vmatpush.msra.mxu1 %v863_v51  ;;  %954 = vmatpush.msra.mxu0 %v737_v2  ;;  %v786_v36 = vld [vmem:[#allocation11 + $0x2e0] sm:$0xff]  ;;  %v796_v33 = vld [vmem:[#allocation11 + $0x330] sm:$0xff]  ;;  %v797_v49 = vld [vmem:[#allocation11 + $0x338] sm:$0xff] }
 0x250   :  { %v613_v61 = vadd.f32 %v2726_v28, %v612_v52  ;;  %2104 = vmatmul.msk.f32.gmra.mxu1 %vm428_vm2, %v480_v54  ;;  %2106 = vmatmul.msk.f32.gmra.mxu2 %vm428_vm2, %v480_v54  ;;  %v814_v38 = vld [vmem:[#allocation11 + $0x3c0] sm:$0xff]  ;;  %v763_v51 = vld [vmem:[#allocation11 + $0x228] sm:$0xff]  ;;  %v757_v55 = vld [vmem:[#allocation11 + $0x1f8] sm:$0xff] }
 0x251   :  { %973 = vmatpush.msra.mxu1 %v857_v0  ;;  %909 = vmatpush.msrb.mxu2 %v730_v6  ;;  %v774_v45 = vld [vmem:[#allocation11 + $0x280] sm:$0xff]  ;;  %v791_v52 = vld [vmem:[#allocation11 + $0x308] sm:$0xff]  ;;  %v744_v1 = vld [vmem:[#allocation11 + $0x190] sm:$0xff] }
 0x252   :  { %v617_v3 = vsel %vm616_vm6, %v2726_v28, %v613_v61  ;;  %955 = vmatpush.msra.mxu0 %v731_v8  ;;  %929 = vmatpush.msrb.mxu3 %v844_v9  ;;  %v820_v28 = vld [vmem:[#allocation11 + $0x3f0] sm:$0xff]  ;;  %v790_v27 = vld [vmem:[#allocation11 + $0x300] sm:$0xff]  ;;  %v883_v60 = vld [vmem:[#allocation11 + $0x5e8] sm:$0xff] }
 0x253   :  { %v622_v5 = vsel %vm619_vm7, %v621_v30, %v617_v3  ;;  %974 = vmatpush.msra.mxu1 %v851_v4  ;;  %910 = vmatpush.msrb.mxu2 %v724_v10  ;;  %v882_v54 = vld [vmem:[#allocation11 + $0x5e0] sm:$0xff]  ;;  %v751_v0 = vld [vmem:[#allocation11 + $0x1c8] sm:$0xff]  ;;  %v877_v30 = vld [vmem:[#allocation11 + $0x5b8] sm:$0xff] }
 0x254   :  { %v623_v7 = vmul.f32 %v622_v5, %v2688_v34  ;;  %v839_v34 = vld [vmem:[#allocation11 + $0x488] sm:$0xff]  ;;  %956 = vmatpush.msra.mxu0 %v725_v13  ;;  %930 = vmatpush.msrb.mxu3 %v838_v15  ;;  %v750_v61 = vld [vmem:[#allocation11 + $0x1c0] sm:$0xff]  ;;  %v745_v3 = vld [vmem:[#allocation11 + $0x198] sm:$0xff] }
 0x255   :  { %975 = vmatpush.msra.mxu1 %v845_v11  ;;  %911 = vmatpush.msrb.mxu2 %v718_v14  ;;  %v870_v2 = vld [vmem:[#allocation11 + $0x580] sm:$0xff]  ;;  %v871_v59 = vld [vmem:[#allocation11 + $0x588] sm:$0xff]  ;;  %v864_v5 = vld [vmem:[#allocation11 + $0x550] sm:$0xff] }
 0x256   :  { %2108 = vmatmul.msk.f32.gmra.mxu0 %vm428_vm2, %v623_v7  ;;  %931 = vmatpush.msrb.mxu3 %v832_v18  ;;  %v738_v4 = vld [vmem:[#allocation11 + $0x160] sm:$0xff]  ;;  %v739_v6 = vld [vmem:[#allocation11 + $0x168] sm:$0xff]  ;;  %v732_v8 = vld [vmem:[#allocation11 + $0x130] sm:$0xff] }
 0x257   :  { %957 = vmatpush.msra.mxu0 %v719_v16  ;;  %976 = vmatpush.msra.mxu1 %v839_v34  ;;  %v858_v9 = vld [vmem:[#allocation11 + $0x520] sm:$0xff]  ;;  %v733_v10 = vld [vmem:[#allocation11 + $0x138] sm:$0xff]  ;;  %v859_v11 = vld [vmem:[#allocation11 + $0x528] sm:$0xff] }
 0x258   :  { %2109 = vmatmul.msk.f32.vlgmr.msrb.gmra.mxu1 %vm428_vm2, %v2745_v12  ;;  %912 = vmatpush.msrb.mxu2 %v712_v17  ;;  %v802_v12 = vld [vmem:[#allocation11 + $0x360] sm:$0xff]  ;;  %v852_v14 = vld [vmem:[#allocation11 + $0x4f0] sm:$0xff]  ;;  %v727_v15 = vld [vmem:[#allocation11 + $0x108] sm:$0xff] }
 0x259   :  { %958 = vmatpush.msra.mxu0 %v713_v19  ;;  %977 = vmatpush.msra.mxu1 %v833_v21  ;;  %v726_v13 = vld [vmem:[#allocation11 + $0x100] sm:$0xff]  ;;  %v853_v16 = vld [vmem:[#allocation11 + $0x4f8] sm:$0xff]  ;;  %v720_v34 = vld [vmem:[#allocation11 + $0xd0] sm:$0xff] }
 0x25a   :  { %913 = vmatpush.msrb.mxu2 %v706_v23  ;;  %932 = vmatpush.msrb.mxu3 %v826_v24  ;;  %v846_v17 = vld [vmem:[#allocation11 + $0x4c0] sm:$0xff]  ;;  %v721_v18 = vld [vmem:[#allocation11 + $0xd8] sm:$0xff]  ;;  %v847_v19 = vld [vmem:[#allocation11 + $0x4c8] sm:$0xff] }
 0x25b   :  { %959 = vmatpush.msra.mxu0 %v707_v25  ;;  %978 = vmatpush.msra.mxu1 %v827_v26  ;;  %v714_v21 = vld [vmem:[#allocation11 + $0xa0] sm:$0xff]  ;;  %v840_v23 = vld [vmem:[#allocation11 + $0x490] sm:$0xff]  ;;  %v715_v24 = vld [vmem:[#allocation11 + $0xa8] sm:$0xff] }
 0x25c   :  { %914 = vmatpush.msrb.mxu2 %v700_v20  ;;  %933 = vmatpush.msrb.mxu3 %v820_v28  ;;  %v841_v25 = vld [vmem:[#allocation11 + $0x498] sm:$0xff]  ;;  %v708_v26 = vld [vmem:[#allocation11 + $0x70] sm:$0xff]  ;;  %v834_v20 = vld [vmem:[#allocation11 + $0x460] sm:$0xff] }
 0x25d   :  { %960 = vmatpush.msra.mxu0 %v701_v29  ;;  %979 = vmatpush.msra.mxu1 %v821_v32  ;;  %v709_v28 = vld [vmem:[#allocation11 + $0x78] sm:$0xff]  ;;  %v835_v29 = vld [vmem:[#allocation11 + $0x468] sm:$0xff]  ;;  %v828_v32 = vld [vmem:[#allocation11 + $0x430] sm:$0xff] }
 0x25e   :  { %915 = vmatpush.msrb.mxu2 %v694_v31  ;;  %934 = vmatpush.msrb.mxu3 %v814_v38  ;;  %v702_v31 = vld [vmem:[#allocation11 + $0x40] sm:$0xff] }
 0x25f   :  { %961 = vmatpush.msra.mxu0 %v695_v35  ;;  %980 = vmatpush.msra.mxu1 %v815_v39  ;;  %v703_v35 = vld [vmem:[#allocation11 + $0x48] sm:$0xff]  ;;  %v822_v38 = vld [vmem:[#allocation11 + $0x400] sm:$0xff]  ;;  %v697_v39 = vld [vmem:[#allocation11 + $0x18] sm:$0xff] }
 0x260   :  { %2110 = vmatmul.msk.f32.gmra.mxu1 %vm428_vm2, %v623_v7  ;;  %992 = vmatpush.msra.mxu2 %v786_v36  ;;  %v865_v7 = vld [vmem:[#allocation11 + $0x558] sm:$0xff] }
 0x261   :  { %1038 = vmatpush.msrb.mxu0 %v787_v37  ;;  %935 = vmatpush.msrb.mxu3 %v808_v43  ;;  %v829_v36 = vld [vmem:[#allocation11 + $0x438] sm:$0xff]  ;;  %v696_v37 = vld [vmem:[#allocation11 + $0x10] sm:$0xff] }
 0x262   :  { %993 = vmatpush.msra.mxu2 %v780_v40  ;;  %981 = vmatpush.msra.mxu1 %v809_v44  ;;  %v823_v40 = vld [vmem:[#allocation11 + $0x408] sm:$0xff]  ;;  %v817_v43 = vld [vmem:[#allocation11 + $0x3d8] sm:$0xff]  ;;  %v810_v44 = vld [vmem:[#allocation11 + $0x3a0] sm:$0xff] }
 0x263   :  { %1039 = vmatpush.msrb.mxu0 %v781_v42  ;;  %936 = vmatpush.msrb.mxu3 %v802_v12  ;;  %v816_v42 = vld [vmem:[#allocation11 + $0x3d0] sm:$0xff]  ;;  %v805_v12 = vld [vmem:[#allocation11 + $0x378] sm:$0xff] }
 0x264   :  { %994 = vmatpush.msra.mxu2 %v774_v45  ;;  %982 = vmatpush.msra.mxu1 %v803_v47  ;;  %v811_v45 = vld [vmem:[#allocation11 + $0x3a8] sm:$0xff]  ;;  %v798_v47 = vld [vmem:[#allocation11 + $0x340] sm:$0xff] }
 0x265   :  { %1040 = vmatpush.msrb.mxu0 %v775_v46  ;;  %937 = vmatpush.msrb.mxu3 %v796_v33  ;;  %v804_v46 = vld [vmem:[#allocation11 + $0x370] sm:$0xff]  ;;  %v793_v33 = vld [vmem:[#allocation11 + $0x318] sm:$0xff] }
 0x266   :  { %995 = vmatpush.msra.mxu2 %v768_v22  ;;  %983 = vmatpush.msra.mxu1 %v797_v49  ;;  %v799_v22 = vld [vmem:[#allocation11 + $0x348] sm:$0xff]  ;;  %v371_v49 = vpop.f32.mrf.mxu2 }
 0x267   :  { %1041 = vmatpush.msrb.mxu0 %v769_v48  ;;  %938 = vmatpush.msrb.mxu3 %v790_v27  ;;  %v792_v48 = vld [vmem:[#allocation11 + $0x310] sm:$0xff] }
 0x268   :  { %996 = vmatpush.msra.mxu2 %v762_v50  ;;  %984 = vmatpush.msra.mxu1 %v791_v52  ;;  %v348_v50 = vld [vmem:[#allocation10] sm:$0x3] }
 0x269   :  { %1042 = vmatpush.msrb.mxu0 %v763_v51  ;;  %1015 = vmatpush.msra.mxu3 %v882_v54  ;;  %v350_v51 = vperm.slane %v348_v50, 0 }
 0x26a   :  { %997 = vmatpush.msra.mxu2 %v756_v53  ;;  %1061 = vmatpush.msrb.mxu1 %v883_v60 }
 0x26b   :  { %1043 = vmatpush.msrb.mxu0 %v757_v55  ;;  %1016 = vmatpush.msra.mxu3 %v876_v63  ;;  %v372_v52 = vadd.f32 %v371_v49, %v350_v51  ;;  %v729_v49 = vld [vmem:[#allocation11 + $0x118] sm:$0xff] }
 0x26c   :  { %998 = vmatpush.msra.mxu2 %v750_v61  ;;  %1062 = vmatpush.msrb.mxu1 %v877_v30  ;;  %v788_v30 = vld [vmem:[#allocation11 + $0x2f0] sm:$0xff] }
 0x26d   :  { %1044 = vmatpush.msrb.mxu0 %v751_v0  ;;  %1017 = vmatpush.msra.mxu3 %v870_v2  ;;  %v351_v2 = vperm.slane %v348_v50, 1  ;;  %v855_v50 = vld [vmem:[#allocation11 + $0x508] sm:$0xff] }
 0x26e   :  { %999 = vmatpush.msra.mxu2 %v744_v1  ;;  %1063 = vmatpush.msrb.mxu1 %v871_v59  ;;  %v374_v53 = vpop.f32.mrf.mxu2  ;;  %v789_v1 = vld [vmem:[#allocation11 + $0x2f8] sm:$0xff]  ;;  %v782_v59 = vld [vmem:[#allocation11 + $0x2c0] sm:$0xff] }
 0x26f   :  { %1045 = vmatpush.msrb.mxu0 %v745_v3  ;;  %1018 = vmatpush.msra.mxu3 %v864_v5  ;;  %v375_v61 = vadd.f32 %v374_v53, %v350_v51  ;;  %v722_v51 = vld [vmem:[#allocation11 + $0xe0] sm:$0xff]  ;;  %v849_v53 = vld [vmem:[#allocation11 + $0x4d8] sm:$0xff] }
 0x270   :  { %1000 = vmatpush.msra.mxu2 %v738_v4  ;;  %1064 = vmatpush.msrb.mxu1 %v865_v7  ;;  %v783_v4 = vld [vmem:[#allocation11 + $0x2c8] sm:$0xff]  ;;  %v777_v7 = vld [vmem:[#allocation11 + $0x298] sm:$0xff] }
 0x271   :  { %1046 = vmatpush.msrb.mxu0 %v739_v6  ;;  %1019 = vmatpush.msra.mxu3 %v858_v9  ;;  %v776_v6 = vld [vmem:[#allocation11 + $0x290] sm:$0xff] }
 0x272   :  { %1001 = vmatpush.msra.mxu2 %v732_v8  ;;  %1065 = vmatpush.msrb.mxu1 %v859_v11  ;;  %v395_v8 = vadd.f32 %v2646_v56, %v351_v2  ;;  %v770_v11 = vld [vmem:[#allocation11 + $0x260] sm:$0xff] }
 0x273   :  { %1047 = vmatpush.msrb.mxu0 %v733_v10  ;;  %1020 = vmatpush.msra.mxu3 %v852_v14 }
 0x274   :  { %1002 = vmatpush.msra.mxu2 %v726_v13  ;;  %1066 = vmatpush.msrb.mxu1 %v853_v16  ;;  %v771_v13 = vld [vmem:[#allocation11 + $0x268] sm:$0xff] }
 0x275   :  { %1048 = vmatpush.msrb.mxu0 %v727_v15  ;;  %1021 = vmatpush.msra.mxu3 %v846_v17  ;;  %v765_v17 = vld [vmem:[#allocation11 + $0x238] sm:$0xff] }
 0x276   :  { %1003 = vmatpush.msra.mxu2 %v720_v34  ;;  %1067 = vmatpush.msrb.mxu1 %v847_v19  ;;  %v764_v34 = vld [vmem:[#allocation11 + $0x230] sm:$0xff]  ;;  %v758_v19 = vld [vmem:[#allocation11 + $0x200] sm:$0xff] }
 0x277   :  { %1049 = vmatpush.msrb.mxu0 %v721_v18  ;;  %1022 = vmatpush.msra.mxu3 %v840_v23 }
 0x278   :  { %1004 = vmatpush.msra.mxu2 %v714_v21  ;;  %1068 = vmatpush.msrb.mxu1 %v841_v25  ;;  %v884_v21 = vld [vmem:[#allocation11 + $0x5f0] sm:$0xff]  ;;  %v885_v25 = vld [vmem:[#allocation11 + $0x5f8] sm:$0xff] }
 0x279   :  { %1050 = vmatpush.msrb.mxu0 %v715_v24  ;;  %1023 = vmatpush.msra.mxu3 %v834_v20  ;;  %v759_v24 = vld [vmem:[#allocation11 + $0x208] sm:$0xff]  ;;  %v752_v20 = vld [vmem:[#allocation11 + $0x1d0] sm:$0xff] }
 0x27a   :  { %1005 = vmatpush.msra.mxu2 %v708_v26  ;;  %1069 = vmatpush.msrb.mxu1 %v835_v29  ;;  %v398_v26 = vadd.f32 %v2650_v58, %v351_v2  ;;  %v753_v29 = vld [vmem:[#allocation11 + $0x1d8] sm:$0xff] }
 0x27b   :  { %1051 = vmatpush.msrb.mxu0 %v709_v28  ;;  %1024 = vmatpush.msra.mxu3 %v828_v32  ;;  %v878_v28 = vld [vmem:[#allocation11 + $0x5c0] sm:$0xff]  ;;  %v873_v58 = vld [vmem:[#allocation11 + $0x598] sm:$0xff] }
 0x27c   :  { %1006 = vmatpush.msra.mxu2 %v702_v31  ;;  %1070 = vmatpush.msrb.mxu1 %v829_v36  ;;  %v879_v31 = vld [vmem:[#allocation11 + $0x5c8] sm:$0xff]  ;;  %v872_v36 = vld [vmem:[#allocation11 + $0x590] sm:$0xff]  ;;  %v837_v2 = vld [vmem:[#allocation11 + $0x478] sm:$0xff] }
 0x27d   :  { %1052 = vmatpush.msrb.mxu0 %v703_v35  ;;  %1025 = vmatpush.msra.mxu3 %v822_v38  ;;  %v746_v35 = vld [vmem:[#allocation11 + $0x1a0] sm:$0xff]  ;;  %v747_v38 = vld [vmem:[#allocation11 + $0x1a8] sm:$0xff] }
 0x27e   :  { %1007 = vmatpush.msra.mxu2 %v696_v37  ;;  %1071 = vmatpush.msrb.mxu1 %v823_v40  ;;  %v740_v40 = vld [vmem:[#allocation11 + $0x170] sm:$0xff] }
 0x27f   :  { %1053 = vmatpush.msrb.mxu0 %v697_v39  ;;  %1026 = vmatpush.msra.mxu3 %v816_v42  ;;  %v866_v42 = vld [vmem:[#allocation11 + $0x560] sm:$0xff] }
 0x280   :  { %1072 = vmatpush.msrb.mxu1 %v817_v43 }
 0x281   :  { %1027 = vmatpush.msra.mxu3 %v810_v44  ;;  %v741_v44 = vld [vmem:[#allocation11 + $0x178] sm:$0xff] }
 0x282   :  { %1073 = vmatpush.msrb.mxu1 %v811_v45  ;;  %v867_v45 = vld [vmem:[#allocation11 + $0x568] sm:$0xff] }
 0x283   :  { %1028 = vmatpush.msra.mxu3 %v804_v46  ;;  %v734_v46 = vld [vmem:[#allocation11 + $0x140] sm:$0xff] }
 0x284   :  { %1074 = vmatpush.msrb.mxu1 %v805_v12  ;;  %v860_v12 = vld [vmem:[#allocation11 + $0x530] sm:$0xff] }
 0x285   :  { %1029 = vmatpush.msra.mxu3 %v798_v47  ;;  %v735_v47 = vld [vmem:[#allocation11 + $0x148] sm:$0xff] }
 0x286   :  { %1075 = vmatpush.msrb.mxu1 %v799_v22  ;;  %v861_v22 = vld [vmem:[#allocation11 + $0x538] sm:$0xff] }
 0x287   :  { %1030 = vmatpush.msra.mxu3 %v792_v48  ;;  %v728_v48 = vld [vmem:[#allocation11 + $0x110] sm:$0xff] }
 0x288   :  { %1076 = vmatpush.msrb.mxu1 %v793_v33  ;;  %v854_v33 = vld [vmem:[#allocation11 + $0x500] sm:$0xff] }
 0x2c5   :  { %v514_v27 = vpop.f32.mrf.mxu1 }
 0x2c6   :  { %v543_v54 = vadd.f32 %v514_v27, %v372_v52  ;;  %v848_v27 = vld [vmem:[#allocation11 + $0x4d0] sm:$0xff]  ;;  %v723_v52 = vld [vmem:[#allocation11 + $0xe8] sm:$0xff] }
 0x2cb   :  { %v657_v55 = vpop.f32.mrf.mxu0  ;;  %v537_v3 = vpop.f32.mrf.mxu2 }
 0x2cc   :  { %v686_v60 = vadd.f32 %v657_v55, %v543_v54  ;;  %v544_v14 = vadd.f32 %v537_v3, %v395_v8  ;;  %v716_v54 = vld [vmem:[#allocation11 + $0xb0] sm:$0xff]  ;;  %v842_v55 = vld [vmem:[#allocation11 + $0x4a0] sm:$0xff]  ;;  %v699_v8 = vld [vmem:[#allocation11 + $0x28] sm:$0xff] }
 0x2cd   :  { %v517_v0 = vpop.f32.mrf.mxu1  ;;  %v704_v3 = vld [vmem:[#allocation11 + $0x50] sm:$0xff] }
 0x2ce   :  { %v2769_v63 = vmax.f32 %v686_v60, 0.0  ;;  %v545_v5 = vadd.f32 %v517_v0, %v375_v61  ;;  %v717_v60 = vld [vmem:[#allocation11 + $0xb8] sm:$0xff]  ;;  %v843_v61 = vld [vmem:[#allocation11 + $0x4a8] sm:$0xff]  ;;  %v710_v0 = vld [vmem:[#allocation11 + $0x80] sm:$0xff] }
 0x2d0   :  { %916 = vmatmul.f32.vlgmr.msrb.gmra.mxu2 %v2769_v63  ;;  %962 = vmatmul.f32.vlgmr.msra.gmra.mxu0 %v2769_v63 }
 0x2d1   :  { %1084 = vmatpush.msrb.mxu2 %v788_v30  ;;  %1130 = vmatpush.msra.mxu0 %v789_v1  ;;  %v836_v30 = vld [vmem:[#allocation11 + $0x470] sm:$0xff]  ;;  %v711_v1 = vld [vmem:[#allocation11 + $0x88] sm:$0xff] }
 0x2d3   :  { %1085 = vmatpush.msrb.mxu2 %v782_v59  ;;  %1131 = vmatpush.msra.mxu0 %v783_v4  ;;  %v660_v9 = vpop.f32.mrf.mxu0  ;;  %v540_v23 = vpop.f32.mrf.mxu2  ;;  %v830_v59 = vld [vmem:[#allocation11 + $0x440] sm:$0xff]  ;;  %v705_v4 = vld [vmem:[#allocation11 + $0x58] sm:$0xff] }
 0x2d4   :  { %v688_v10 = vadd.f32 %v660_v9, %v545_v5  ;;  %v546_v32 = vadd.f32 %v540_v23, %v398_v26  ;;  %v831_v5 = vld [vmem:[#allocation11 + $0x448] sm:$0xff]  ;;  %v825_v9 = vld [vmem:[#allocation11 + $0x418] sm:$0xff]  ;;  %v806_v23 = vld [vmem:[#allocation11 + $0x380] sm:$0xff] }
 0x2d5   :  { %1086 = vmatpush.msrb.mxu2 %v776_v6  ;;  %1132 = vmatpush.msra.mxu0 %v777_v7  ;;  %v680_v16 = vpop.f32.mrf.mxu1  ;;  %v698_v6 = vld [vmem:[#allocation11 + $0x20] sm:$0xff]  ;;  %v824_v7 = vld [vmem:[#allocation11 + $0x410] sm:$0xff] }
 0x2d6   :  { %v2774_v15 = vmax.f32 %v688_v10, 0.0  ;;  %v687_v18 = vadd.f32 %v680_v16, %v544_v14  ;;  %v1206_v10 = vld [vmem:[%s3404_s8 + $0xf0] sm:$0xff]  ;;  %v1204_v16 = vld [vmem:[%s3404_s8 + $0xe0] sm:$0xff]  ;;  %v1201_v26 = vld [vmem:[%s3404_s8 + $0xc8] sm:$0xff] }
 0x2d7   :  { %1087 = vmatpush.msrb.mxu2 %v770_v11  ;;  %1133 = vmatpush.msra.mxu0 %v771_v13  ;;  %v1207_v11 = vld [vmem:[%s3404_s8 + $0xf8] sm:$0xff]  ;;  %v818_v13 = vld [vmem:[#allocation11 + $0x3e0] sm:$0xff]  ;;  %v819_v14 = vld [vmem:[#allocation11 + $0x3e8] sm:$0xff] }
 0x2d8   :  { %919 = vmatmul.f32.gmra.mxu2 %v2774_v15  ;;  %965 = vmatmul.f32.gmra.mxu0 %v2774_v15  ;;  %v2778_v56 = vmax.f32 %v687_v18, 0.0  ;;  %v813_v18 = vld [vmem:[#allocation11 + $0x3b8] sm:$0xff] }
 0x2d9   :  { %1088 = vmatpush.msrb.mxu2 %v764_v34  ;;  %1134 = vmatpush.msra.mxu0 %v765_v17  ;;  %v1205_v34 = vld [vmem:[%s3404_s8 + $0xe8] sm:$0xff]  ;;  %v812_v17 = vld [vmem:[#allocation11 + $0x3b0] sm:$0xff] }
 0x2da   :  { %939 = vmatmul.f32.vlgmr.msrb.gmra.mxu3 %v2778_v56  ;;  %985 = vmatmul.f32.vlgmr.msra.gmra.mxu1 %v2778_v56 }
 0x2db   :  { %1089 = vmatpush.msrb.mxu2 %v758_v19  ;;  %1107 = vmatpush.msrb.mxu3 %v884_v21  ;;  %v1202_v19 = vld [vmem:[%s3404_s8 + $0xd0] sm:$0xff]  ;;  %v1203_v21 = vld [vmem:[%s3404_s8 + $0xd8] sm:$0xff] }
 0x2dc   :  { %1135 = vmatpush.msra.mxu0 %v759_v24  ;;  %1153 = vmatpush.msra.mxu1 %v885_v25  ;;  %v807_v24 = vld [vmem:[#allocation11 + $0x388] sm:$0xff]  ;;  %v1200_v25 = vld [vmem:[%s3404_s8 + $0xc0] sm:$0xff] }
 0x2dd   :  { %1090 = vmatpush.msrb.mxu2 %v752_v20  ;;  %1108 = vmatpush.msrb.mxu3 %v878_v28  ;;  %v683_v37 = vpop.f32.mrf.mxu1  ;;  %v800_v20 = vld [vmem:[#allocation11 + $0x350] sm:$0xff]  ;;  %v801_v28 = vld [vmem:[#allocation11 + $0x358] sm:$0xff] }
 0x2de   :  { %1136 = vmatpush.msra.mxu0 %v753_v29  ;;  %1154 = vmatpush.msra.mxu1 %v879_v31  ;;  %v689_v39 = vadd.f32 %v683_v37, %v546_v32  ;;  %v1198_v29 = vld [vmem:[%s3404_s8 + $0xb0] sm:$0xff]  ;;  %v1199_v31 = vld [vmem:[%s3404_s8 + $0xb8] sm:$0xff]  ;;  %v794_v32 = vld [vmem:[#allocation11 + $0x320] sm:$0xff] }
 0x2df   :  { %1091 = vmatpush.msrb.mxu2 %v746_v35  ;;  %1109 = vmatpush.msrb.mxu3 %v872_v36  ;;  %v795_v35 = vld [vmem:[#allocation11 + $0x328] sm:$0xff]  ;;  %v1196_v36 = vld [vmem:[%s3404_s8 + $0xa0] sm:$0xff] }
 0x2e0   :  { %v2783_v43 = vmax.f32 %v689_v39, 0.0  ;;  %1137 = vmatpush.msra.mxu0 %v747_v38  ;;  %1155 = vmatpush.msra.mxu1 %v873_v58  ;;  %v1238_v37 = vld [vmem:[%s3404_s8 + $0x1f0] sm:$0xff]  ;;  %v1197_v38 = vld [vmem:[%s3404_s8 + $0xa8] sm:$0xff]  ;;  %v1239_v58 = vld [vmem:[%s3404_s8 + $0x1f8] sm:$0xff] }
 0x2e1   :  { %1008 = vmatmul.f32.vlgmr.msra.gmra.mxu2 %v2769_v63  ;;  %1054 = vmatmul.f32.vlgmr.msrb.gmra.mxu0 %v2769_v63  ;;  %v1194_v39 = vld [vmem:[%s3404_s8 + $0x90] sm:$0xff] }
 0x2e2   :  { %1092 = vmatpush.msrb.mxu2 %v740_v40  ;;  %1110 = vmatpush.msrb.mxu3 %v866_v42  ;;  %v1236_v40 = vld [vmem:[%s3404_s8 + $0x1e0] sm:$0xff]  ;;  %v1195_v42 = vld [vmem:[%s3404_s8 + $0x98] sm:$0xff] }
 0x2e3   :  { %1138 = vmatpush.msra.mxu0 %v741_v44  ;;  %1156 = vmatpush.msra.mxu1 %v867_v45  ;;  %v1237_v44 = vld [vmem:[%s3404_s8 + $0x1e8] sm:$0xff]  ;;  %v1192_v45 = vld [vmem:[%s3404_s8 + $0x80] sm:$0xff] }
 0x2e4   :  { %942 = vmatmul.f32.gmra.mxu3 %v2783_v43  ;;  %988 = vmatmul.f32.gmra.mxu1 %v2783_v43 }
 0x2e5   :  { %1093 = vmatpush.msrb.mxu2 %v734_v46  ;;  %1111 = vmatpush.msrb.mxu3 %v860_v12  ;;  %v1234_v46 = vld [vmem:[%s3404_s8 + $0x1d0] sm:$0xff]  ;;  %v1193_v12 = vld [vmem:[%s3404_s8 + $0x88] sm:$0xff] }
 0x2e6   :  { %1139 = vmatpush.msra.mxu0 %v735_v47  ;;  %1157 = vmatpush.msra.mxu1 %v861_v22  ;;  %v1235_v47 = vld [vmem:[%s3404_s8 + $0x1d8] sm:$0xff]  ;;  %v1190_v22 = vld [vmem:[%s3404_s8 + $0x70] sm:$0xff] }
 0x2e7   :  { %1094 = vmatpush.msrb.mxu2 %v728_v48  ;;  %1112 = vmatpush.msrb.mxu3 %v854_v33  ;;  %v1232_v48 = vld [vmem:[%s3404_s8 + $0x1c0] sm:$0xff]  ;;  %v1191_v33 = vld [vmem:[%s3404_s8 + $0x78] sm:$0xff] }
 0x2e8   :  { %1140 = vmatpush.msra.mxu0 %v729_v49  ;;  %1158 = vmatpush.msra.mxu1 %v855_v50  ;;  %v1233_v49 = vld [vmem:[%s3404_s8 + $0x1c8] sm:$0xff]  ;;  %v1188_v50 = vld [vmem:[%s3404_s8 + $0x60] sm:$0xff] }
 0x2e9   :  { %1095 = vmatpush.msrb.mxu2 %v722_v51  ;;  %1113 = vmatpush.msrb.mxu3 %v848_v27  ;;  %v1230_v51 = vld [vmem:[%s3404_s8 + $0x1b0] sm:$0xff]  ;;  %v1189_v27 = vld [vmem:[%s3404_s8 + $0x68] sm:$0xff] }
 0x2ea   :  { %1141 = vmatpush.msra.mxu0 %v723_v52  ;;  %1159 = vmatpush.msra.mxu1 %v849_v53  ;;  %v1231_v52 = vld [vmem:[%s3404_s8 + $0x1b8] sm:$0xff]  ;;  %v1186_v53 = vld [vmem:[%s3404_s8 + $0x50] sm:$0xff] }
 0x2eb   :  { %1011 = vmatmul.f32.gmra.mxu2 %v2774_v15  ;;  %1057 = vmatmul.f32.gmra.mxu0 %v2774_v15 }
 0x2ec   :  { %1096 = vmatpush.msrb.mxu2 %v716_v54  ;;  %1114 = vmatpush.msrb.mxu3 %v842_v55  ;;  %v1228_v54 = vld [vmem:[%s3404_s8 + $0x1a0] sm:$0xff]  ;;  %v1187_v55 = vld [vmem:[%s3404_s8 + $0x58] sm:$0xff] }
 0x2ed   :  { %1142 = vmatpush.msra.mxu0 %v717_v60  ;;  %1160 = vmatpush.msra.mxu1 %v843_v61  ;;  %v1229_v60 = vld [vmem:[%s3404_s8 + $0x1a8] sm:$0xff]  ;;  %v1184_v61 = vld [vmem:[%s3404_s8 + $0x40] sm:$0xff] }
 0x2ee   :  { %1031 = vmatmul.f32.vlgmr.msra.gmra.mxu3 %v2778_v56  ;;  %1077 = vmatmul.f32.vlgmr.msrb.gmra.mxu1 %v2778_v56 }
 0x2ef   :  { %1097 = vmatpush.msrb.mxu2 %v710_v0  ;;  %1115 = vmatpush.msrb.mxu3 %v836_v30  ;;  %v1226_v0 = vld [vmem:[%s3404_s8 + $0x190] sm:$0xff]  ;;  %v1185_v30 = vld [vmem:[%s3404_s8 + $0x48] sm:$0xff] }
 0x2f0   :  { %1143 = vmatpush.msra.mxu0 %v711_v1  ;;  %1161 = vmatpush.msra.mxu1 %v837_v2  ;;  %v1227_v1 = vld [vmem:[%s3404_s8 + $0x198] sm:$0xff]  ;;  %v1182_v2 = vld [vmem:[%s3404_s8 + $0x30] sm:$0xff] }
 0x2f1   :  { %1098 = vmatpush.msrb.mxu2 %v704_v3  ;;  %1116 = vmatpush.msrb.mxu3 %v830_v59  ;;  %v1224_v3 = vld [vmem:[%s3404_s8 + $0x180] sm:$0xff]  ;;  %v1183_v59 = vld [vmem:[%s3404_s8 + $0x38] sm:$0xff] }
 0x2f2   :  { %1144 = vmatpush.msra.mxu0 %v705_v4  ;;  %1162 = vmatpush.msra.mxu1 %v831_v5  ;;  %v1225_v4 = vld [vmem:[%s3404_s8 + $0x188] sm:$0xff]  ;;  %v1180_v5 = vld [vmem:[%s3404_s8 + $0x20] sm:$0xff] }
 0x2f3   :  { %1099 = vmatpush.msrb.mxu2 %v698_v6  ;;  %1117 = vmatpush.msrb.mxu3 %v824_v7  ;;  %v1222_v6 = vld [vmem:[%s3404_s8 + $0x170] sm:$0xff]  ;;  %v1181_v7 = vld [vmem:[%s3404_s8 + $0x28] sm:$0xff] }
 0x2f4   :  { %1145 = vmatpush.msra.mxu0 %v699_v8  ;;  %1163 = vmatpush.msra.mxu1 %v825_v9  ;;  %v1223_v8 = vld [vmem:[%s3404_s8 + $0x178] sm:$0xff]  ;;  %v1178_v9 = vld [vmem:[%s3404_s8 + $0x10] sm:$0xff] }
 0x2f5   :  { %1246 = vmatpush.msra.mxu2 %v1206_v10  ;;  %1118 = vmatpush.msrb.mxu3 %v818_v13  ;;  %v1220_v10 = vld [vmem:[%s3404_s8 + $0x160] sm:$0xff]  ;;  %v1221_v13 = vld [vmem:[%s3404_s8 + $0x168] sm:$0xff] }
 0x2f6   :  { %1292 = vmatpush.msrb.mxu0 %v1207_v11  ;;  %1100 = vmatmul.f32.vlgmr.msrb.gmra.mxu2 %v2769_v63  ;;  %v1179_v11 = vld [vmem:[%s3404_s8 + $0x18] sm:$0xff] }
 0x2f7   :  { %1146 = vmatmul.f32.vlgmr.msra.gmra.mxu0 %v2769_v63  ;;  %1164 = vmatpush.msra.mxu1 %v819_v14  ;;  %v1176_v14 = vld [vmem:[%s3404_s8] sm:$0xff] }
 0x2f8   :  { %1247 = vmatpush.msra.mxu2 %v1204_v16  ;;  %1293 = vmatpush.msrb.mxu0 %v1205_v34  ;;  %v1218_v16 = vld [vmem:[%s3404_s8 + $0x150] sm:$0xff]  ;;  %v1177_v34 = vld [vmem:[%s3404_s8 + $0x8] sm:$0xff] }
 0x2f9   :  { %1034 = vmatmul.f32.gmra.mxu3 %v2783_v43  ;;  %1080 = vmatmul.f32.gmra.mxu1 %v2783_v43 }
 0x2fa   :  { %1119 = vmatpush.msrb.mxu3 %v812_v17  ;;  %1165 = vmatpush.msra.mxu1 %v813_v18  ;;  %v1219_v17 = vld [vmem:[%s3404_s8 + $0x158] sm:$0xff]  ;;  %v1216_v18 = vld [vmem:[%s3404_s8 + $0x140] sm:$0xff] }
 0x2fb   :  { %1248 = vmatpush.msra.mxu2 %v1202_v19  ;;  %1294 = vmatpush.msrb.mxu0 %v1203_v21  ;;  %v1217_v19 = vld [vmem:[%s3404_s8 + $0x148] sm:$0xff]  ;;  %v1214_v21 = vld [vmem:[%s3404_s8 + $0x130] sm:$0xff] }
 0x2fc   :  { %1120 = vmatpush.msrb.mxu3 %v806_v23  ;;  %1166 = vmatpush.msra.mxu1 %v807_v24  ;;  %v1215_v23 = vld [vmem:[%s3404_s8 + $0x138] sm:$0xff]  ;;  %v1212_v24 = vld [vmem:[%s3404_s8 + $0x120] sm:$0xff] }
 0x2fd   :  { %1249 = vmatpush.msra.mxu2 %v1200_v25  ;;  %1295 = vmatpush.msrb.mxu0 %v1201_v26  ;;  %v1213_v25 = vld [vmem:[%s3404_s8 + $0x128] sm:$0xff]  ;;  %v1211_v26 = vld [vmem:[%s3404_s8 + $0x118] sm:$0xff] }
 0x2fe   :  { %1121 = vmatpush.msrb.mxu3 %v800_v20  ;;  %1167 = vmatpush.msra.mxu1 %v801_v28  ;;  %v1208_v20 = vld [vmem:[%s3404_s8 + $0x100] sm:$0xff]  ;;  %v1209_v28 = vld [vmem:[%s3404_s8 + $0x108] sm:$0xff] }
 0x2ff   :  { %1250 = vmatpush.msra.mxu2 %v1198_v29  ;;  %1296 = vmatpush.msrb.mxu0 %v1199_v31 }
 0x300   :  { %1103 = vmatmul.f32.gmra.mxu2 %v2774_v15  ;;  %1122 = vmatpush.msrb.mxu3 %v794_v32 }
 0x301   :  { %1149 = vmatmul.f32.gmra.mxu0 %v2774_v15  ;;  %1168 = vmatpush.msra.mxu1 %v795_v35 }
 0x302   :  { %1251 = vmatpush.msra.mxu2 %v1196_v36  ;;  %1269 = vmatpush.msra.mxu3 %v1238_v37 }
 0x303   :  { %1297 = vmatpush.msrb.mxu0 %v1197_v38  ;;  %1315 = vmatpush.msrb.mxu1 %v1239_v58 }
 0x304   :  { %1123 = vmatmul.f32.vlgmr.msrb.gmra.mxu3 %v2778_v56  ;;  %1169 = vmatmul.f32.vlgmr.msra.gmra.mxu1 %v2778_v56 }
 0x305   :  { %1252 = vmatpush.msra.mxu2 %v1194_v39  ;;  %1270 = vmatpush.msra.mxu3 %v1236_v40 }
 0x306   :  { %1298 = vmatpush.msrb.mxu0 %v1195_v42  ;;  %1316 = vmatpush.msrb.mxu1 %v1237_v44  ;;  %v886_v42 = vld [vmem:[#allocation13] sm:$0x3f] }
 0x307   :  { %1253 = vmatpush.msra.mxu2 %v1192_v45  ;;  %1271 = vmatpush.msra.mxu3 %v1234_v46  ;;  %v891_v46 = vperm.slane %v886_v42, 3 }
 0x308   :  { %1299 = vmatpush.msrb.mxu0 %v1193_v12  ;;  %1317 = vmatpush.msrb.mxu1 %v1235_v47 }
 0x309   :  { %1254 = vmatpush.msra.mxu2 %v1190_v22  ;;  %1272 = vmatpush.msra.mxu3 %v1232_v48  ;;  %v889_v22 = vperm.slane %v886_v42, 1 }
 0x30a   :  { %1300 = vmatpush.msrb.mxu0 %v1191_v33  ;;  %1318 = vmatpush.msrb.mxu1 %v1233_v49  ;;  %v890_v33 = vperm.slane %v886_v42, 2 }
 0x30b   :  { %1255 = vmatpush.msra.mxu2 %v1188_v50  ;;  %1273 = vmatpush.msra.mxu3 %v1230_v51 }
 0x30c   :  { %1301 = vmatpush.msrb.mxu0 %v1189_v27  ;;  %1319 = vmatpush.msrb.mxu1 %v1231_v52 }
 0x30d   :  { %1126 = vmatmul.f32.gmra.mxu3 %v2783_v43  ;;  %1172 = vmatmul.f32.gmra.mxu1 %v2783_v43 }
 0x30e   :  { %1256 = vmatpush.msra.mxu2 %v1186_v53  ;;  %1274 = vmatpush.msra.mxu3 %v1228_v54  ;;  %v888_v53 = vperm.slane %v886_v42, 0 }
 0x30f   :  { %1302 = vmatpush.msrb.mxu0 %v1187_v55  ;;  %1320 = vmatpush.msrb.mxu1 %v1229_v60 }
 0x310   :  { %1257 = vmatpush.msra.mxu2 %v1184_v61  ;;  %1275 = vmatpush.msra.mxu3 %v1226_v0 }
 0x311   :  { %1303 = vmatpush.msrb.mxu0 %v1185_v30  ;;  %1321 = vmatpush.msrb.mxu1 %v1227_v1 }
 0x312   :  { %1258 = vmatpush.msra.mxu2 %v1182_v2  ;;  %1276 = vmatpush.msra.mxu3 %v1224_v3 }
 0x313   :  { %1304 = vmatpush.msrb.mxu0 %v1183_v59  ;;  %1322 = vmatpush.msrb.mxu1 %v1225_v4 }
 0x314   :  { %1259 = vmatpush.msra.mxu2 %v1180_v5  ;;  %1277 = vmatpush.msra.mxu3 %v1222_v6 }
 0x315   :  { %1305 = vmatpush.msrb.mxu0 %v1181_v7  ;;  %1323 = vmatpush.msrb.mxu1 %v1223_v8  ;;  %v892_v8 = vperm.slane %v886_v42, 4 }
 0x316   :  { %1260 = vmatpush.msra.mxu2 %v1178_v9  ;;  %1278 = vmatpush.msra.mxu3 %v1220_v10 }
 0x317   :  { %1306 = vmatpush.msrb.mxu0 %v1179_v11  ;;  %1324 = vmatpush.msrb.mxu1 %v1221_v13  ;;  %v893_v11 = vperm.slane %v886_v42, 5 }
 0x318   :  { %1261 = vmatpush.msra.mxu2 %v1176_v14  ;;  %1279 = vmatpush.msra.mxu3 %v1218_v16 }
 0x319   :  { %1307 = vmatpush.msrb.mxu0 %v1177_v34  ;;  %1325 = vmatpush.msrb.mxu1 %v1219_v17 }
 0x31a   :  { %1262 = vmatmul.f32.vlgmr.msra.gmra.mxu2 %v2769_v63  ;;  %1308 = vmatmul.f32.vlgmr.msrb.gmra.mxu0 %v2769_v63  ;;  %v1210_v63 = vld [vmem:[%s3404_s8 + $0x110] sm:$0xff] }
 0x31b   :  { %1280 = vmatpush.msra.mxu3 %v1216_v18  ;;  %1326 = vmatpush.msrb.mxu1 %v1217_v19 }
 0x31c   :  { %1463 = vmatpush.msra.mxu0 %v2427_v41 }
 0x31d   :  { %1281 = vmatpush.msra.mxu3 %v1214_v21  ;;  %1327 = vmatpush.msrb.mxu1 %v1215_v23 }
 0x31f   :  { %1282 = vmatpush.msra.mxu3 %v1212_v24  ;;  %1328 = vmatpush.msrb.mxu1 %v1213_v25 }
 0x321   :  { %1283 = vmatpush.msra.mxu3 %v1210_v63  ;;  %1329 = vmatpush.msrb.mxu1 %v1211_v26 }
 0x322   :  { %1265 = vmatmul.f32.gmra.mxu2 %v2774_v15  ;;  %1311 = vmatmul.f32.gmra.mxu0 %v2774_v15 }
 0x323   :  { %1284 = vmatpush.msra.mxu3 %v1208_v20  ;;  %1330 = vmatpush.msrb.mxu1 %v1209_v28 }
 0x324   :  { %1285 = vmatmul.f32.vlgmr.msra.gmra.mxu3 %v2778_v56  ;;  %1331 = vmatmul.f32.vlgmr.msrb.gmra.mxu1 %v2778_v56 }
 0x32c   :  { %1288 = vmatmul.f32.gmra.mxu3 %v2783_v43  ;;  %1334 = vmatmul.f32.gmra.mxu1 %v2783_v43 }
 0x34d   :  { %v963_v29 = vpop.f32.mrf.mxu0 }
 0x34e   :  { %v964_v51 = vadd.f32 %v963_v29, %v889_v22 }
 0x353   :  { %v917_v32 = vpop.f32.mrf.mxu2 }
 0x354   :  { %v918_v61 = vadd.f32 %v917_v32, %v888_v53 }
 0x355   :  { %v966_v35 = vpop.f32.mrf.mxu0 }
 0x356   :  { %v967_v30 = vadd.f32 %v966_v35, %v889_v22 }
 0x357   :  { %v986_v31 = vpop.f32.mrf.mxu1 }
 0x358   :  { %v987_v54 = vadd.f32 %v986_v31, %v964_v51 }
 0x35b   :  { %v920_v38 = vpop.f32.mrf.mxu2 }
 0x35c   :  { %v921_v5 = vadd.f32 %v920_v38, %v888_v53 }
 0x35d   :  { %v940_v36 = vpop.f32.mrf.mxu3 }
 0x35e   :  { %v1055_v58 = vpop.f32.mrf.mxu0  ;;  %v941_v1 = vadd.f32 %v940_v36, %v918_v61 }
 0x35f   :  { %v1056_v48 = vadd.f32 %v1055_v58, %v891_v46 }
 0x361   :  { %v989_v37 = vpop.f32.mrf.mxu1 }
 0x362   :  { %v990_v3 = vadd.f32 %v989_v37, %v967_v30 }
 0x364   :  { %v1009_v40 = vpop.f32.mrf.mxu2 }
 0x365   :  { %v1010_v55 = vadd.f32 %v1009_v40, %v890_v33 }
 0x367   :  { %v943_v39 = vpop.f32.mrf.mxu3 }
 0x368   :  { %v1058_v44 = vpop.f32.mrf.mxu0  ;;  %v944_v6 = vadd.f32 %v943_v39, %v921_v5 }
 0x369   :  { %v1059_v56 = vadd.f32 %v1058_v44, %v891_v46 }
 0x36b   :  { %v1078_v15 = vpop.f32.mrf.mxu1 }
 0x36c   :  { %v1079_v49 = vadd.f32 %v1078_v15, %v1056_v48 }
 0x36e   :  { %v1012_v43 = vpop.f32.mrf.mxu2 }
 0x36f   :  { %v1013_v50 = vadd.f32 %v1012_v43, %v890_v33 }
 0x371   :  { %v1032_v45 = vpop.f32.mrf.mxu3 }
 0x372   :  { %v1033_v60 = vadd.f32 %v1032_v45, %v1010_v55 }
 0x374   :  { %v1147_v2 = vpop.f32.mrf.mxu0 }
 0x375   :  { %v1148_v18 = vadd.f32 %v1147_v2, %v893_v11 }
 0x376   :  { %v1081_v12 = vpop.f32.mrf.mxu1 }
 0x377   :  { %v1082_v47 = vadd.f32 %v1081_v12, %v1059_v56 }
 0x379   :  { %1489 = vmatpush.xpose.msra.mxu1 %v1082_v47  ;;  %v1101_v0 = vpop.f32.mrf.mxu2 }
 0x37a   :  { %v1102_v14 = vadd.f32 %v1101_v0, %v892_v8 }
 0x37c   :  { %v1035_v27 = vpop.f32.mrf.mxu3 }
 0x37d   :  { %v1036_v52 = vadd.f32 %v1035_v27, %v1013_v50  ;;  %1490 = vmatpush.xpose.msra.mxu1 %v1079_v49 }
 0x37e   :  { %v1150_v9 = vpop.f32.mrf.mxu0 }
 0x37f   :  { %1352 = vmatpush.xpose.msrb.mxu2 %v1036_v52  ;;  %v1151_v17 = vadd.f32 %v1150_v9, %v893_v11 }
 0x380   :  { %1491 = vmatmul.f32.vlgmr.msra.gmra.mxu1 %v987_v54 }
 0x381   :  { %v1170_v59 = vpop.f32.mrf.mxu1 }
 0x382   :  { %v1171_v21 = vadd.f32 %v1170_v59, %v1148_v18 }
 0x383   :  { %1353 = vmatpush.xpose.msrb.mxu2 %v1033_v60  ;;  %v1104_v7 = vpop.f32.mrf.mxu2 }
 0x384   :  { %v1105_v10 = vadd.f32 %v1104_v7, %v892_v8 }
 0x386   :  { %1354 = vmatmul.f32.vlgmr.msrb.gmra.mxu2 %v941_v1 }
 0x387   :  { %1577 = vmatpush.msra.mxu2 %v2427_v41  ;;  %v1124_v4 = vpop.f32.mrf.mxu3 }
 0x388   :  { %1494 = vmatmul.f32.gmra.mxu1 %v990_v3  ;;  %v1125_v41 = vadd.f32 %v1124_v4, %v1102_v14 }
 0x38a   :  { %v1173_v16 = vpop.f32.mrf.mxu1 }
 0x38b   :  { %v1174_v19 = vadd.f32 %v1173_v16, %v1151_v17 }
 0x38e   :  { %1357 = vmatmul.f32.gmra.mxu2 %v944_v6 }
 0x390   :  { %v1127_v13 = vpop.f32.mrf.mxu3 }
 0x391   :  { %v1128_v34 = vadd.f32 %v1127_v13, %v1105_v10 }
 0x393   :  { %1439 = vmatpush.msrb.mxu3 %v1128_v34 }
 0x395   :  { %1440 = vmatpush.msrb.mxu3 %v1125_v41 }
 0x397   :  { %1599 = vmatpush.msra.mxu3 %v1174_v19 }
 0x399   :  { %1600 = vmatpush.msra.mxu3 %v1171_v21 }
 0x39d   :  { %v3009_v25 = vpop.f32.mrf.mxu2 }
 0x3a1   :  { %v3005_v23 = vpop.f32.mrf.mxu1 }
 0x3a5   :  { %v3014_v28 = vpop.f32.mrf.mxu2 }
 0x3a9   :  { %v3007_v24 = vpop.f32.mrf.mxu1 }
 0x3fd   :  { %v1492_v63 = vpop.f32.mrf.mxu1 }
 0x3fe   :  { %v1498_v26 = vsel %vm153_vm1, %v1492_v63, -1e+30 }
 0x3ff   :  { %v1500_v20 = vsel %vm428_vm2, %v1498_v26, -inf }
 0x400   :  { %1501 = vmax.xlane.f32.xlu1 %v1500_v20 }
 0x405   :  { %v1495_v35 = vpop.f32.mrf.mxu1 }
 0x406   :  { %v1499_v36 = vsel %vm154_vm3, %v1495_v35, -1e+30 }
 0x407   :  { %v1503_v58 = vsel %vm428_vm2, %v1499_v36, -inf }
 0x409   :  { %v1355_v29 = vpop.f32.mrf.mxu2 }
 0x40a   :  { %v1361_v31 = vsel %vm153_vm1, %v1355_v29, -1e+30  ;;  %v1631_v29 = vld [vmem:[%s3406_s10 + $0x78] sm:$0xff] }
 0x40b   :  { %v1363_v32 = vsel %vm428_vm2, %v1361_v31, -inf  ;;  %1652 = vmatpush.msrb.mxu0 %v1631_v29  ;;  %v1643_v29 = vld [vmem:[%s3406_s10 + $0xd8] sm:$0xff] }
 0x40c   :  { %1364 = vmax.xlane.f32.xlu2 %v1363_v32  ;;  %v1630_v32 = vld [vmem:[%s3406_s10 + $0x70] sm:$0xff] }
 0x40d   :  { %1653 = vmatpush.msrb.mxu0 %v1630_v32  ;;  %v1725_v32 = vld [vmem:[%s3408_s12 + $0xd8] sm:$0xff] }
 0x411   :  { %v1358_v37 = vpop.f32.mrf.mxu2 }
 0x412   :  { %v1362_v38 = vsel %vm154_vm3, %v1358_v37, -1e+30 }
 0x413   :  { %v1366_v39 = vsel %vm428_vm2, %v1362_v38, -inf }
 0x414   :  { %1504 = vmax.xlane.f32.xlu2 %v1503_v58  ;;  %1367 = vmax.xlane.f32.xlu0 %v1366_v39  ;;  %v1629_v58 = vld [vmem:[%s3406_s10 + $0x68] sm:$0xff] }
 0x415   :  { %v1711_v39 = vld [vmem:[%s3408_s12 + $0x68] sm:$0xff]  ;;  %1654 = vmatpush.msrb.mxu0 %v1629_v58  ;;  %v1618_v58 = vld [vmem:[%s3406_s10 + $0x10] sm:$0xff] }
 0x473   :  { %v1502_v15 = vpop.xlane.xlu1 %1501 }
 0x474   :  { %v1506_v40 = vsub.f32 %v1498_v26, %v1502_v15 }
 0x476   :  { %v1508_v42 = vmul.f32 1.442695, %v1506_v40 }
 0x478   :  { %2172 = vpow2.f32 %v1508_v42 }
 0x47e   :  { %v2173_v44 = vpop.eup %2172 }
 0x47f   :  { %v1365_v45 = vpop.xlane.xlu2 %1364  ;;  %v1512_v46 = vsel %vm153_vm1, %v2173_v44, 0.0 }
 0x480   :  { %v1369_v56 = vsub.f32 %v1361_v31, %v1365_v45  ;;  %v1514_v12 = vsel %vm428_vm2, %v1512_v46, 0.0  ;;  %v1713_v31 = vld [vmem:[%s3408_s12 + $0x78] sm:$0xff] }
 0x481   :  { %1515 = vadd.xlane.f32.xlu2 %v1514_v12  ;;  %1734 = vmatpush.msrb.mxu2 %v1713_v31  ;;  %v1628_v12 = vld [vmem:[%s3406_s10 + $0x60] sm:$0xff] }
 0x482   :  { %v1371_v47 = vmul.f32 1.442695, %v1369_v56  ;;  %1655 = vmatpush.msrb.mxu0 %v1628_v12  ;;  %v1702_v31 = vld [vmem:[%s3408_s12 + $0x20] sm:$0xff]  ;;  %v1639_v12 = vld [vmem:[%s3406_s10 + $0xb8] sm:$0xff] }
 0x484   :  { %2174 = vpow2.f32 %v1371_v47  ;;  %v1710_v47 = vld [vmem:[%s3408_s12 + $0x60] sm:$0xff] }
 0x487   :  { %v1505_v22 = vpop.xlane.xlu2 %1504  ;;  %v1368_v43 = vpop.xlane.xlu0 %1367 }
 0x488   :  { %v1507_v48 = vsub.f32 %v1499_v36, %v1505_v22  ;;  %v1370_v33 = vsub.f32 %v1362_v38, %v1368_v43  ;;  %v1712_v36 = vld [vmem:[%s3408_s12 + $0x70] sm:$0xff] }
 0x489   :  { %1735 = vmatpush.msrb.mxu2 %v1712_v36  ;;  %v1642_v36 = vld [vmem:[%s3406_s10 + $0xd0] sm:$0xff] }
 0x48a   :  { %v2175_v49 = vpop.eup %2174  ;;  %v1510_v50 = vmul.f32 1.442695, %v1507_v48  ;;  %v1373_v51 = vmul.f32 1.442695, %v1370_v33 }
 0x48b   :  { %v3030_v27 = vsel %vm153_vm1, %v2175_v49, 0.0  ;;  %1736 = vmatpush.msrb.mxu2 %v1711_v39  ;;  %v1641_v39 = vld [vmem:[%s3406_s10 + $0xc8] sm:$0xff] }
 0x48c   :  { %2176 = vpow2.f32 %v1510_v50  ;;  %v1377_v52 = vsel %vm428_vm2, %v3030_v27, 0.0  ;;  %v1627_v50 = vld [vmem:[%s3406_s10 + $0x58] sm:$0xff] }
 0x48d   :  { %2178 = vpow2.f32 %v1373_v51  ;;  %1378 = vadd.xlane.f32.xlu0 %v1377_v52  ;;  %v1709_v51 = vld [vmem:[%s3408_s12 + $0x58] sm:$0xff]  ;;  %1737 = vmatpush.msrb.mxu2 %v1710_v47  ;;  %v1698_v47 = vld [vmem:[%s3408_s12] sm:$0xff] }
 0x48e   :  { %1656 = vmatpush.msrb.mxu0 %v1627_v50  ;;  %v1719_v50 = vld [vmem:[%s3408_s12 + $0xa8] sm:$0xff] }
 0x48f   :  { %1738 = vmatpush.msrb.mxu2 %v1709_v51  ;;  %v1636_v51 = vld [vmem:[%s3406_s10 + $0xa0] sm:$0xff] }
 0x492   :  { %v2177_v53 = vpop.eup %2176 }
 0x493   :  { %v2179_v54 = vpop.eup %2178  ;;  %v3036_v55 = vsel %vm154_vm3, %v2177_v53, 0.0 }
 0x494   :  { %v1517_v60 = vsel %vm428_vm2, %v3036_v55, 0.0  ;;  %v3042_v61 = vsel %vm154_vm3, %v2179_v54, 0.0  ;;  %v1626_v54 = vld [vmem:[%s3406_s10 + $0x50] sm:$0xff] }
 0x495   :  { %1518 = vadd.xlane.f32.xlu0 %v1517_v60  ;;  %v1380_v0 = vsel %vm428_vm2, %v3042_v61, 0.0  ;;  %v1708_v60 = vld [vmem:[%s3408_s12 + $0x50] sm:$0xff]  ;;  %1657 = vmatpush.msrb.mxu0 %v1626_v54 }
 0x496   :  { %1381 = vadd.xlane.f32.xlu1 %v1380_v0  ;;  %1739 = vmatpush.msrb.mxu2 %v1708_v60  ;;  %v1634_v54 = vld [vmem:[%s3406_s10 + $0x90] sm:$0xff] }
 0x497   :  { %v1716_v60 = vld [vmem:[%s3408_s12 + $0x90] sm:$0xff] }
 0x4f4   :  { %v1516_v30 = vpop.xlane.xlu2 %1515 }
 0x4f5   :  { %v1520_v1 = vmax.f32 %v1516_v30, 1e-30 }
 0x4f7   :  { %2180 = vrcp.f32 %v1520_v1  ;;  %v1533_v5 = vand.u32 2147483648, %v1520_v1  ;;  %v1531_v8 = vand.u32 2147483647, %v1520_v1  ;;  %vm1527_vm9 = vweird.f32 %v1520_v1 }
 0x4f9   :  { %v1534_v10 = vor.u32 1.1754944e-38, %v1533_v5  ;;  %vm1532_vm11 = vcmp.eq.f32.partialorder %v1531_v8, 8.507059e+37  ;;  %v1647_v8 = vld [vmem:[%s3406_s10 + $0xf8] sm:$0xff] }
 0x4fa   :  { %1675 = vmatpush.msrb.mxu1 %v1647_v8 }
 0x4fd   :  { %v2181_v2 = vpop.eup %2180 }
 0x4fe   :  { %v1523_v3 = vmul.f32 %v2181_v2, %v1520_v1  ;;  %vm1528_vm8 = vweird.f32 %v2181_v2 }
 0x4ff   :  { %vm1529_vm10 = vmor %vm1527_vm9, %vm1528_vm8 }
 0x500   :  { %v1524_v59 = vsub.f32 1.0, %v1523_v3  ;;  %v1379_v4 = vpop.xlane.xlu0 %1378 }
 0x501   :  { %v1383_v6 = vmax.f32 %v1379_v4, 1e-30 }
 0x502   :  { %v1525_v7 = vmul.f32 %v2181_v2, %v1524_v59 }
 0x503   :  { %2182 = vrcp.f32 %v1383_v6  ;;  %v1396_v63 = vand.u32 2147483648, %v1383_v6  ;;  %v1394_v20 = vand.u32 2147483647, %v1383_v6  ;;  %vm1390_vm13 = vweird.f32 %v1383_v6 }
 0x504   :  { %v1526_v9 = vadd.f32 %v2181_v2, %v1525_v7  ;;  %v1625_v7 = vld [vmem:[%s3406_s10 + $0x48] sm:$0xff] }
 0x505   :  { %v1397_v38 = vor.u32 1.1754944e-38, %v1396_v63  ;;  %vm1395_vm15 = vcmp.eq.f32.partialorder %v1394_v20, 8.507059e+37  ;;  %1658 = vmatpush.msrb.mxu0 %v1625_v7  ;;  %v1703_v63 = vld [vmem:[%s3408_s12 + $0x28] sm:$0xff]  ;;  %v1620_v20 = vld [vmem:[%s3406_s10 + $0x20] sm:$0xff] }
 0x506   :  { %v1530_v11 = vsel %vm1529_vm10, %v2181_v2, %v1526_v9  ;;  %v1706_v9 = vld [vmem:[%s3408_s12 + $0x40] sm:$0xff] }
 0x507   :  { %v1535_v13 = vsel %vm1532_vm11, %v1534_v10, %v1530_v11  ;;  %v1729_v10 = vld [vmem:[%s3408_s12 + $0xf8] sm:$0xff] }
 0x508   :  { %v1519_v14 = vpop.xlane.xlu0 %1518  ;;  %v3046_v16 = vmul.f32 %v1535_v13, %v1512_v46  ;;  %v1623_v11 = vld [vmem:[%s3406_s10 + $0x38] sm:$0xff]  ;;  %v1646_v13 = vld [vmem:[%s3406_s10 + $0xf0] sm:$0xff] }
 0x509   :  { %v2183_v34 = vpop.eup %2182  ;;  %v1382_v17 = vpop.xlane.xlu1 %1381  ;;  %v3048_v41 = vmax.f32 %v1519_v14, 1e-30  ;;  %v1705_v14 = vld [vmem:[%s3408_s12 + $0x38] sm:$0xff]  ;;  %1676 = vmatpush.msrb.mxu1 %v1646_v13 }
 0x50a   :  { %v1386_v18 = vmul.f32 %v2183_v34, %v1383_v6  ;;  %v3050_v19 = vmax.f32 %v1382_v17, 1e-30  ;;  %2115 = vmatmul.msk.f32.vlgmr.msra.gmra.mxu2 %vm428_vm2, %v3046_v16  ;;  %vm1391_vm12 = vweird.f32 %v2183_v34  ;;  %v1645_v17 = vld [vmem:[%s3406_s10 + $0xe8] sm:$0xff] }
 0x50b   :  { %2184 = vrcp.f32 %v3048_v41  ;;  %vm1392_vm14 = vmor %vm1390_vm13, %vm1391_vm12  ;;  %v1548_v43 = vand.u32 2147483648, %v3048_v41  ;;  %v1546_v49 = vand.u32 2147483647, %v3048_v41  ;;  %vm1542_vm6 = vweird.f32 %v3048_v41  ;;  %1677 = vmatpush.msrb.mxu1 %v1645_v17 }
 0x50c   :  { %v1387_v21 = vsub.f32 1.0, %v1386_v18  ;;  %2186 = vrcp.f32 %v3050_v19  ;;  %v1411_v48 = vand.u32 2147483648, %v3050_v19  ;;  %v1409_v52 = vand.u32 2147483647, %v3050_v19  ;;  %v1727_v18 = vld [vmem:[%s3408_s12 + $0xe8] sm:$0xff] }
 0x50d   :  { %vm1405_vm7 = vweird.f32 %v3050_v19  ;;  %v1549_v30 = vor.u32 1.1754944e-38, %v1548_v43  ;;  %vm1547_vm10 = vcmp.eq.f32.partialorder %v1546_v49, 8.507059e+37  ;;  %v1638_v43 = vld [vmem:[%s3406_s10 + $0xb0] sm:$0xff]  ;;  %v1637_v49 = vld [vmem:[%s3406_s10 + $0xa8] sm:$0xff] }
 0x50e   :  { %v1388_v26 = vmul.f32 %v2183_v34, %v1387_v21  ;;  %v1412_v1 = vor.u32 1.1754944e-38, %v1411_v48  ;;  %vm1410_vm11 = vcmp.eq.f32.partialorder %v1409_v52, 8.507059e+37  ;;  %v1644_v21 = vld [vmem:[%s3406_s10 + $0xe0] sm:$0xff]  ;;  %v1720_v48 = vld [vmem:[%s3408_s12 + $0xb0] sm:$0xff]  ;;  %v1635_v52 = vld [vmem:[%s3406_s10 + $0x98] sm:$0xff] }
 0x50f   :  { %1678 = vmatpush.msrb.mxu1 %v1644_v21 }
 0x510   :  { %v1389_v35 = vadd.f32 %v2183_v34, %v1388_v26  ;;  %v1726_v26 = vld [vmem:[%s3408_s12 + $0xe0] sm:$0xff] }
 0x511   :  { %v2185_v37 = vpop.eup %2184  ;;  %1679 = vmatpush.msrb.mxu1 %v1643_v29 }
 0x512   :  { %v2187_v15 = vpop.eup %2186  ;;  %v1538_v40 = vmul.f32 %v2185_v37, %v3048_v41  ;;  %v1393_v42 = vsel %vm1392_vm14, %v2183_v34, %v1389_v35  ;;  %vm1543_vm4 = vweird.f32 %v2185_v37  ;;  %v1622_v34 = vld [vmem:[%s3406_s10 + $0x30] sm:$0xff]  ;;  %v1619_v35 = vld [vmem:[%s3406_s10 + $0x18] sm:$0xff] }
 0x513   :  { %v1401_v44 = vmul.f32 %v2187_v15, %v3050_v19  ;;  %v1398_v45 = vsel %vm1395_vm15, %v1397_v38, %v1393_v42  ;;  %vm1406_vm5 = vweird.f32 %v2187_v15  ;;  %vm1544_vm8 = vmor %vm1542_vm6, %vm1543_vm4  ;;  %v1704_v41 = vld [vmem:[%s3408_s12 + $0x30] sm:$0xff]  ;;  %v1621_v19 = vld [vmem:[%s3406_s10 + $0x28] sm:$0xff]  ;;  %1680 = vmatpush.msrb.mxu1 %v1642_v36 }
 0x514   :  { %v1539_v46 = vsub.f32 1.0, %v1538_v40  ;;  %v1399_v56 = vmul.f32 %v1398_v45, %v3030_v27  ;;  %vm1407_vm9 = vmor %vm1405_vm7, %vm1406_vm5  ;;  %v1724_v38 = vld [vmem:[%s3408_s12 + $0xd0] sm:$0xff]  ;;  %v1723_v40 = vld [vmem:[%s3408_s12 + $0xc8] sm:$0xff] }
 0x515   :  { %v1402_v22 = vsub.f32 1.0, %v1401_v44  ;;  %v1617_v42 = vld [vmem:[%s3406_s10 + $0x8] sm:$0xff]  ;;  %1681 = vmatpush.msrb.mxu1 %v1641_v39  ;;  %v1640_v44 = vld [vmem:[%s3406_s10 + $0xc0] sm:$0xff] }
 0x516   :  { %2111 = vmatmul.msk.f32.vlgmr.msrb.gmra.mxu3 %vm428_vm2, %v1399_v56  ;;  %2113 = vmatmul.msk.f32.vlgmr.msra.gmra.mxu0 %vm428_vm2, %v1399_v56  ;;  %v1540_v33 = vmul.f32 %v2185_v37, %v1539_v46  ;;  %v1699_v45 = vld [vmem:[%s3408_s12 + $0x8] sm:$0xff]  ;;  %v1722_v46 = vld [vmem:[%s3408_s12 + $0xc0] sm:$0xff] }
 0x517   :  { %v1403_v27 = vmul.f32 %v2187_v15, %v1402_v22  ;;  %1757 = vmatpush.msrb.mxu3 %v1729_v10  ;;  %v1616_v56 = vld [vmem:[%s3406_s10] sm:$0xff]  ;;  %1682 = vmatpush.msrb.mxu1 %v1640_v44  ;;  %v1721_v22 = vld [vmem:[%s3408_s12 + $0xb8] sm:$0xff] }
 0x518   :  { %v1541_v53 = vadd.f32 %v2185_v37, %v1540_v33  ;;  %v1286_v33 = vpop.f32.mrf.mxu3  ;;  %v2154_v39 = vld [vmem:[%s3407_s11] ss:$0 sm:$0xff]  ;;  %s2431_s11 = smov 64  }
 0x519   :  { %v1404_v0 = vadd.f32 %v2187_v15, %v1403_v27  ;;  %1683 = vmatpush.msrb.mxu1 %v1639_v12  ;;  %v1718_v27 = vld [vmem:[%s3408_s12 + $0xa0] sm:$0xff] }
 0x51a   :  { %v1545_v2 = vsel %vm1544_vm8, %v2185_v37, %v1541_v53  ;;  %v1701_v37 = vld [vmem:[%s3408_s12 + $0x18] sm:$0xff] }
 0x51b   :  { %v1408_v3 = vsel %vm1407_vm9, %v2187_v15, %v1404_v0  ;;  %v1550_v59 = vsel %vm1547_vm10, %v1549_v30, %v1545_v2  ;;  %v1700_v15 = vld [vmem:[%s3408_s12 + $0x10] sm:$0xff]  ;;  %1684 = vmatpush.msrb.mxu1 %v1638_v43  ;;  %v1717_v53 = vld [vmem:[%s3408_s12 + $0x98] sm:$0xff]  ;;  %v1633_v0 = vld [vmem:[%s3406_s10 + $0x88] sm:$0xff] }
 0x51c   :  { %v1413_v4 = vsel %vm1410_vm11, %v1412_v1, %v1408_v3  ;;  %v1551_v5 = vmul.f32 %v1550_v59, %v3036_v55  ;;  %v1707_v55 = vld [vmem:[%s3408_s12 + $0x48] sm:$0xff]  ;;  %v1632_v1 = vld [vmem:[%s3406_s10 + $0x80] sm:$0xff] }
 0x51d   :  { %v1414_v6 = vmul.f32 %v1413_v4, %v3042_v61  ;;  %v1624_v61 = vld [vmem:[%s3406_s10 + $0x40] sm:$0xff]  ;;  %1740 = vmatpush.msrb.mxu2 %v1707_v55  ;;  %1685 = vmatpush.msrb.mxu1 %v1637_v49  ;;  %v1715_v30 = vld [vmem:[%s3408_s12 + $0x88] sm:$0xff]  ;;  %v1309_v4 = vpop.f32.mrf.mxu0 }
 0x51e   :  { %2116 = vmatmul.msk.f32.gmra.mxu2 %vm428_vm2, %v1551_v5  ;;  %1659 = vmatpush.msrb.mxu0 %v1624_v61  ;;  %v1714_v2 = vld [vmem:[%s3408_s12 + $0x80] sm:$0xff] }
 0x51f   :  { %2112 = vmatmul.msk.f32.gmra.mxu3 %vm428_vm2, %v1414_v6  ;;  %2114 = vmatmul.msk.f32.gmra.mxu0 %vm428_vm2, %v1414_v6  ;;  %v1240_v3 = vld [vmem:[%s3405_s9] sm:$0x3] }
 0x520   :  { %1741 = vmatpush.msrb.mxu2 %v1706_v9  ;;  %1660 = vmatpush.msrb.mxu0 %v1623_v11  ;;  %v1289_v59 = vpop.f32.mrf.mxu3 }
 0x521   :  { %1686 = vmatpush.msrb.mxu1 %v1636_v51 }
 0x522   :  { %1742 = vmatpush.msrb.mxu2 %v1705_v14  ;;  %1661 = vmatpush.msrb.mxu0 %v1622_v34  ;;  %v1243_v14 = vperm.slane %v1240_v3, 1 }
 0x523   :  { %1687 = vmatpush.msrb.mxu1 %v1635_v52 }
 0x524   :  { %1743 = vmatpush.msrb.mxu2 %v1704_v41  ;;  %1662 = vmatpush.msrb.mxu0 %v1621_v19  ;;  %v1310_v19 = vadd.f32 %v1309_v4, %v1243_v14 }
 0x525   :  { %1688 = vmatpush.msrb.mxu1 %v1634_v54  ;;  %v1312_v9 = vpop.f32.mrf.mxu0 }
 0x526   :  { %1744 = vmatpush.msrb.mxu2 %v1703_v63  ;;  %1663 = vmatpush.msrb.mxu0 %v1620_v20 }
 0x527   :  { %2117 = vmatmul.msk.f32.vlgmr.msra.gmra.mxu3 %vm428_vm2, %v3046_v16  ;;  %v1728_v16 = vld [vmem:[%s3408_s12 + $0xf0] sm:$0xff]  ;;  %1689 = vmatpush.msrb.mxu1 %v1633_v0  ;;  %s2428_s12 = smov 112  }
 0x528   :  { %1758 = vmatpush.msrb.mxu3 %v1728_v16  ;;  %1745 = vmatpush.msrb.mxu2 %v1702_v31  ;;  %v1313_v31 = vadd.f32 %v1312_v9, %v1243_v14 }
 0x529   :  { %1664 = vmatpush.msrb.mxu0 %v1619_v35  ;;  %1690 = vmatpush.msrb.mxu1 %v1632_v1 }
 0x52a   :  { %1759 = vmatpush.msrb.mxu3 %v1727_v18  ;;  %1746 = vmatpush.msrb.mxu2 %v1701_v37  ;;  %v1336_v35 = vadd.f32 %v3007_v24, %v1313_v31 }
 0x52b   :  { %1665 = vmatpush.msrb.mxu0 %v1618_v58 }
 0x52c   :  { %1760 = vmatpush.msrb.mxu3 %v1726_v26  ;;  %1747 = vmatpush.msrb.mxu2 %v1700_v15 }
 0x52d   :  { %1666 = vmatpush.msrb.mxu0 %v1617_v42 }
 0x52e   :  { %1761 = vmatpush.msrb.mxu3 %v1725_v32  ;;  %1748 = vmatpush.msrb.mxu2 %v1699_v45 }
 0x52f   :  { %2118 = vmatmul.msk.f32.gmra.mxu3 %vm428_vm2, %v1551_v5  ;;  %1667 = vmatpush.msrb.mxu0 %v1616_v56  ;;  %v1242_v5 = vperm.slane %v1240_v3, 0 }
 0x530   :  { %1762 = vmatpush.msrb.mxu3 %v1724_v38  ;;  %1749 = vmatpush.msrb.mxu2 %v1698_v47 }
 0x531   :  { %v1264_v6 = vadd.f32 %v3009_v25, %v1242_v5  ;;  %v1267_v13 = vadd.f32 %v3014_v28, %v1242_v5  ;;  %v1333_v25 = vadd.f32 %v3005_v23, %v1310_v19 }
 0x532   :  { %1763 = vmatpush.msrb.mxu3 %v1723_v40 }
 0x533   :  { %v1287_v7 = vadd.f32 %v1286_v33, %v1264_v6  ;;  %v1290_v16 = vadd.f32 %v1289_v59, %v1267_v13 }
 0x534   :  { %1764 = vmatpush.msrb.mxu3 %v1722_v46 }
 0x536   :  { %1765 = vmatpush.msrb.mxu3 %v1721_v22 }
 0x538   :  { %1766 = vmatpush.msrb.mxu3 %v1720_v48 }
 0x53a   :  { %1767 = vmatpush.msrb.mxu3 %v1719_v50 }
 0x53c   :  { %1768 = vmatpush.msrb.mxu3 %v1718_v27 }
 0x53e   :  { %1769 = vmatpush.msrb.mxu3 %v1717_v53 }
 0x540   :  { %1770 = vmatpush.msrb.mxu3 %v1716_v60 }
 0x542   :  { %1771 = vmatpush.msrb.mxu3 %v1715_v30 }
 0x544   :  { %1772 = vmatpush.msrb.mxu3 %v1714_v2 }
 0x58d   :  { %v1579_v8 = vpop.f32.mrf.mxu2 }
 0x593   :  { %v1465_v41 = vpop.f32.mrf.mxu0 }
 0x594   :  { %v1472_v26 = vadd.f32 %v1465_v41, %v1333_v25 }
 0x599   :  { %v1442_v55 = vpop.f32.mrf.mxu3 }
 0x59a   :  { %v1471_v61 = vadd.f32 %v1442_v55, %v1287_v7 }
 0x59c   :  { %v1608_v10 = vadd.f32 %v1579_v8, %v1471_v61  ;;  %v1468_v32 = vpop.f32.mrf.mxu0 }
 0x59d   :  { %v1474_v36 = vadd.f32 %v1468_v32, %v1336_v35  ;;  %v400_v32 = vlaneseq }
 0x59e   :  { %v1612_v11 = vmax.f32 %v1608_v10, 0.0 }
 0x59f   :  { %v3340_v62 = vand.u32 127, %v400_v32 }
 0x5a0   :  { %1668 = vmatmul.f32.vlgmr.msrb.gmra.mxu0 %v1612_v11  ;;  %1750 = vmatmul.f32.vlgmr.msrb.gmra.mxu2 %v1612_v11 }
 0x5a1   :  { %v1582_v18 = vpop.f32.mrf.mxu2  ;;  %vm1871_vm14 = vcmp.lt.s32.totalorder %v3340_v62, 16 }
 0x5a2   :  { %v1445_v34 = vpop.f32.mrf.mxu3 }
 0x5a3   :  { %v1473_v17 = vadd.f32 %v1445_v34, %v1290_v16 }
 0x5a5   :  { %v1610_v21 = vadd.f32 %v1582_v18, %v1473_v17 }
 0x5a7   :  { %v1614_v63 = vmax.f32 %v1610_v21, 0.0 }
 0x5a9   :  { %1671 = vmatmul.f32.gmra.mxu0 %v1614_v63  ;;  %1753 = vmatmul.f32.gmra.mxu2 %v1614_v63 }
 0x5aa   :  { %v1602_v20 = vpop.f32.mrf.mxu3 }
 0x5ab   :  { %v1609_v29 = vadd.f32 %v1602_v20, %v1472_v26 }
 0x5ad   :  { %v1613_v28 = vmax.f32 %v1609_v29, 0.0 }
 0x5af   :  { %1691 = vmatmul.f32.vlgmr.msrb.gmra.mxu1 %v1613_v28  ;;  %1773 = vmatmul.f32.vlgmr.msrb.gmra.mxu3 %v1613_v28 }
 0x5b2   :  { %v1605_v37 = vpop.f32.mrf.mxu3 }
 0x5b3   :  { %v1611_v38 = vadd.f32 %v1605_v37, %v1474_v36 }
 0x5b5   :  { %v1615_v58 = vmax.f32 %v1611_v38, 0.0 }
 0x5b7   :  { %1694 = vmatmul.f32.gmra.mxu1 %v1615_v58  ;;  %1776 = vmatmul.f32.gmra.mxu3 %v1615_v58 }
 0x61d   :  { %v1669_v23 = vpop.f32.mrf.mxu0 }
 0x61e   :  { %v1670_v15 = vadd.f32 %v2154_v39, %v1669_v23 }
 0x623   :  { %v3298_v33 = vpop.f32.mrf.mxu2 }
 0x626   :  { %v1672_v24 = vpop.f32.mrf.mxu0 }
 0x627   :  { %v1673_v44 = vadd.f32 %v2154_v39, %v1672_v24 }
 0x62c   :  { %v1692_v40 = vpop.f32.mrf.mxu1  ;;  %v3300_v49 = vpop.f32.mrf.mxu2 }
 0x62d   :  { %v3278_v42 = vadd.f32 %v1692_v40, %v1670_v15 }
 0x62f   :  { %1912 = vrot.lane.b32.xlu0 %v3278_v42, %s2428_s12  ;;  %1916 = vrot.lane.b32.xlu2 %v3278_v42, %s2429_s29 }
 0x634   :  { %v1695_v45 = vpop.f32.mrf.mxu1 }
 0x635   :  { %v3282_v46 = vadd.f32 %v1695_v45, %v1673_v44 }
 0x637   :  { %1914 = vrot.lane.b32.xlu0 %v3282_v46, %s2428_s12  ;;  %1784 = vrot.lane.b32.xlu2 %v3282_v46, %s2430_s4 }
 0x638   :  { %1918 = vrot.lane.b32.xlu1 %v3282_v46, %s2429_s29 }
 0x640   :  { %1782 = vrot.lane.b32.xlu1 %v3278_v42, %s2430_s4 }
 0x689   :  { %v1917_v56 = vpop.permute.xlu2 %1916 }
 0x691   :  { %v1785_v12 = vpop.permute.xlu2 %1784 }
 0x692   :  { %2119 = vmatpush.xpose.msk.msra.mxu0 %vm428_vm2, %v1785_v12 }
 0x6a1   :  { %v1913_v22 = vpop.permute.xlu0 %1912 }
 0x6a9   :  { %v1915_v48 = vpop.permute.xlu0 %1914 }
 0x6aa   :  { %v1919_v47 = vpop.permute.xlu1 %1918 }
 0x6ab   :  { %2127 = vmatpush.xpose.msk.msra.mxu2 %vm428_vm2, %v1919_v47 }
 0x6af   :  { %2128 = vmatpush.xpose.msk.msra.mxu2 %vm428_vm2, %v1917_v56 }
 0x6b2   :  { %v1783_v43 = vpop.permute.xlu1 %1782  ;;  %2129 = vmatmul.msk.f32.vlgmr.msra.gmra.mxu2 %vm428_vm2, %v1913_v22 }
 0x6b3   :  { %2120 = vmatpush.xpose.msk.msra.mxu0 %vm428_vm2, %v1783_v43 }
 0x6b6   :  { %2121 = vmatmul.msk.f32.vlgmr.msra.gmra.mxu0 %vm428_vm2, %v3278_v42 }
 0x6ba   :  { %2130 = vmatmul.msk.f32.gmra.mxu2 %vm428_vm2, %v1915_v48 }
 0x6be   :  { %2122 = vmatmul.msk.f32.gmra.mxu0 %vm428_vm2, %v3282_v46 }
 0x733   :  { %v1811_v50 = vpop.f32.mrf.mxu0 }
 0x734   :  { %v1817_v51 = vsel %vm153_vm1, %v1811_v50, -1e+30 }
 0x735   :  { %v1945_v27 = vpop.f32.mrf.mxu2  ;;  %v1819_v52 = vsel %vm428_vm2, %v1817_v51, -inf }
 0x736   :  { %v1951_v53 = vsel %vm153_vm1, %v1945_v27, -1e+30  ;;  %1820 = vmax.xlane.f32.xlu1 %v1819_v52 }
 0x737   :  { %v1953_v54 = vsel %vm428_vm2, %v1951_v53, -inf }
 0x738   :  { %1954 = vmax.xlane.f32.xlu2 %v1953_v54 }
 0x73b   :  { %v1814_v60 = vpop.f32.mrf.mxu0 }
 0x73c   :  { %v1818_v0 = vsel %vm154_vm3, %v1814_v60, -1e+30 }
 0x73d   :  { %v1948_v30 = vpop.f32.mrf.mxu2  ;;  %v1822_v2 = vsel %vm428_vm2, %v1818_v0, -inf }
 0x73e   :  { %v1952_v1 = vsel %vm154_vm3, %v1948_v30, -1e+30 }
 0x73f   :  { %v1956_v3 = vsel %vm428_vm2, %v1952_v1, -inf }
 0x740   :  { %1823 = vmax.xlane.f32.xlu2 %v1822_v2  ;;  %1957 = vmax.xlane.f32.xlu0 %v1956_v3 }
 0x7a9   :  { %v1821_v59 = vpop.xlane.xlu1 %1820 }
 0x7aa   :  { %v1825_v4 = vsub.f32 %v1817_v51, %v1821_v59 }
 0x7ab   :  { %v1955_v5 = vpop.xlane.xlu2 %1954 }
 0x7ac   :  { %v1827_v6 = vmul.f32 1.442695, %v1825_v4  ;;  %v1959_v7 = vsub.f32 %v1951_v53, %v1955_v5 }
 0x7ae   :  { %2188 = vpow2.f32 %v1827_v6  ;;  %v1961_v55 = vmul.f32 1.442695, %v1959_v7 }
 0x7b0   :  { %2190 = vpow2.f32 %v1961_v55 }
 0x7b3   :  { %v1824_v61 = vpop.xlane.xlu2 %1823  ;;  %v1958_v8 = vpop.xlane.xlu0 %1957 }
 0x7b4   :  { %v2189_v9 = vpop.eup %2188  ;;  %v1826_v10 = vsub.f32 %v1818_v0, %v1824_v61  ;;  %v1960_v11 = vsub.f32 %v1952_v1, %v1958_v8 }
 0x7b5   :  { %v3316_v13 = vsel %vm153_vm1, %v2189_v9, 0.0 }
 0x7b6   :  { %v2191_v14 = vpop.eup %2190  ;;  %v1829_v16 = vmul.f32 1.442695, %v1826_v10  ;;  %v1963_v34 = vmul.f32 1.442695, %v1960_v11  ;;  %v1833_v17 = vsel %vm428_vm2, %v3316_v13, 0.0 }
 0x7b7   :  { %1834 = vadd.xlane.f32.xlu0 %v1833_v17  ;;  %v3322_v41 = vsel %vm153_vm1, %v2191_v14, 0.0  ;;  %vm2005_vm1 = vcmp.ge.s32.totalorder %v3340_v62, 16 }
 0x7b8   :  { %2192 = vpow2.f32 %v1829_v16  ;;  %v1967_v18 = vsel %vm428_vm2, %v3322_v41, 0.0 }
 0x7b9   :  { %2194 = vpow2.f32 %v1963_v34  ;;  %1968 = vadd.xlane.f32.xlu1 %v1967_v18 }
 0x7be   :  { %v2193_v19 = vpop.eup %2192 }
 0x7bf   :  { %v2195_v21 = vpop.eup %2194  ;;  %v3328_v25 = vsel %vm154_vm3, %v2193_v19, 0.0 }
 0x7c0   :  { %v1836_v63 = vsel %vm428_vm2, %v3328_v25, 0.0  ;;  %v3334_v57 = vsel %vm154_vm3, %v2195_v21, 0.0  ;;  %vm2006_vm3 = vcmp.lt.s32.totalorder %v3340_v62, 32  ;;  %v1774_v21 = vpop.f32.mrf.mxu3 }
 0x7c1   :  { %1837 = vadd.xlane.f32.xlu1 %v1836_v63  ;;  %v1970_v26 = vsel %vm428_vm2, %v3334_v57, 0.0  ;;  %vm3351_vm15 = vmand %vm2005_vm1, %vm2006_vm3  ;;  %v2155_v63 = vld [vmem:[%s3409_s13] ss:$0 sm:$0xff]  ;;  %s2432_s13 = smov [#allocation14]  }
 0x7c2   :  { %1971 = vadd.xlane.f32.xlu2 %v1970_v26  ;;  %s2069_s30 = sshll.u32 %s2432_s13, 4  ;;  %s2070_s30 = int_to_ptr.vmem [resolvable:$true] %s2069_s30 }
 0x7c8   :  { %v1777_v26 = vpop.f32.mrf.mxu3 }
 0x7cb   :  { %1875 = vrot.lane.b32.xlu0 %v3282_v46, %s2431_s11 }
 0x7da   :  { %1873 = vrot.lane.b32.xlu2 %v3278_v42, %s2431_s11 }
 0x82a   :  { %v1835_v20 = vpop.xlane.xlu0 %1834 }
 0x82b   :  { %v1839_v29 = vmax.f32 %v1835_v20, 1e-30 }
 0x82c   :  { %v1969_v31 = vpop.xlane.xlu1 %1968 }
 0x82d   :  { %2196 = vrcp.f32 %v1839_v29  ;;  %v1973_v28 = vmax.f32 %v1969_v31, 1e-30  ;;  %v1852_v40 = vand.u32 2147483648, %v1839_v29  ;;  %v1850_v44 = vand.u32 2147483647, %v1839_v29 }
 0x82e   :  { %vm1846_vm13 = vweird.f32 %v1839_v29 }
 0x82f   :  { %2198 = vrcp.f32 %v1973_v28  ;;  %v1986_v56 = vand.u32 2147483648, %v1973_v28  ;;  %v1853_v47 = vor.u32 1.1754944e-38, %v1852_v40  ;;  %v1984_v43 = vand.u32 2147483647, %v1973_v28 }
 0x830   :  { %vm1851_vm6 = vcmp.eq.f32.partialorder %v1850_v44, 8.507059e+37  ;;  %vm1980_vm7 = vweird.f32 %v1973_v28 }
 0x831   :  { %v1987_v54 = vor.u32 1.1754944e-38, %v1986_v56  ;;  %vm1985_vm9 = vcmp.eq.f32.partialorder %v1984_v43, 8.507059e+37 }
 0x833   :  { %v2197_v35 = vpop.eup %2196 }
 0x834   :  { %v1842_v36 = vmul.f32 %v2197_v35, %v1839_v29  ;;  %v1838_v37 = vpop.xlane.xlu1 %1837  ;;  %vm1847_vm12 = vweird.f32 %v2197_v35  ;;  %v1752_v29 = vadd.f32 %v2155_v63, %v3298_v33 }
 0x835   :  { %v3342_v38 = vmax.f32 %v1838_v37, 1e-30  ;;  %v1972_v58 = vpop.xlane.xlu2 %1971  ;;  %v2199_v23 = vpop.eup %2198  ;;  %vm1848_vm4 = vmor %vm1846_vm13, %vm1847_vm12 }
 0x836   :  { %v1843_v39 = vsub.f32 1.0, %v1842_v36  ;;  %v3344_v15 = vmax.f32 %v1972_v58, 1e-30  ;;  %v1976_v42 = vmul.f32 %v2199_v23, %v1973_v28  ;;  %vm1981_vm5 = vweird.f32 %v2199_v23 }
 0x837   :  { %2200 = vrcp.f32 %v3342_v38  ;;  %vm1982_vm8 = vmor %vm1980_vm7, %vm1981_vm5  ;;  %v1867_v6 = vand.u32 2147483648, %v3342_v38  ;;  %v1865_v55 = vand.u32 2147483647, %v3342_v38  ;;  %vm1861_vm1 = vweird.f32 %v3342_v38 }
 0x838   :  { %v1844_v24 = vmul.f32 %v2197_v35, %v1843_v39  ;;  %2202 = vrcp.f32 %v3344_v15  ;;  %v1977_v45 = vsub.f32 1.0, %v1976_v42  ;;  %v2001_v61 = vand.u32 2147483648, %v3344_v15 }
 0x839   :  { %v1999_v9 = vand.u32 2147483647, %v3344_v15  ;;  %v1868_v11 = vor.u32 1.1754944e-38, %v1867_v6  ;;  %vm1995_vm12 = vweird.f32 %v3344_v15  ;;  %vm1866_vm13 = vcmp.eq.f32.partialorder %v1865_v55, 8.507059e+37 }
 0x83a   :  { %v1845_v46 = vadd.f32 %v2197_v35, %v1844_v24  ;;  %v1978_v22 = vmul.f32 %v2199_v23, %v1977_v45  ;;  %v2002_v16 = vor.u32 1.1754944e-38, %v2001_v61  ;;  %v1775_v31 = vadd.f32 %v1774_v21, %v1752_v29 }
 0x83c   :  { %v1849_v48 = vsel %vm1848_vm4, %v2197_v35, %v1845_v46  ;;  %v1979_v51 = vadd.f32 %v2199_v23, %v1978_v22  ;;  %vm2000_vm4 = vcmp.eq.f32.partialorder %v1999_v9, 8.507059e+37  ;;  %v1755_v35 = vadd.f32 %v2155_v63, %v3300_v49 }
 0x83d   :  { %v2201_v50 = vpop.eup %2200  ;;  %v1876_v27 = vpop.permute.xlu0 %1875  ;;  %v1854_v52 = vsel %vm1851_vm6, %v1853_v47, %v1849_v48 }
 0x83e   :  { %v2203_v53 = vpop.eup %2202  ;;  %v1857_v60 = vmul.f32 %v2201_v50, %v3342_v38  ;;  %2123 = vmatpush.msk.msra.mxu1 %vm1871_vm14, %v1876_v27  ;;  %2131 = vmatpush.msk.msra.mxu3 %vm3351_vm15, %v1876_v27  ;;  %v1855_v0 = vmul.f32 %v1854_v52, %v3316_v13  ;;  %v1874_v1 = vpop.permute.xlu2 %1873  ;;  %v1983_v2 = vsel %vm1982_vm8, %v2199_v23, %v1979_v51  ;;  %vm1862_vm10 = vweird.f32 %v2201_v50 }
 0x83f   :  { %v1991_v30 = vmul.f32 %v2203_v53, %v3344_v15  ;;  %v1988_v59 = vsel %vm1985_vm9, %v1987_v54, %v1983_v2  ;;  %vm1996_vm11 = vweird.f32 %v2203_v53  ;;  %vm1863_vm3 = vmor %vm1861_vm1, %vm1862_vm10  ;;  %v1778_v37 = vadd.f32 %v1777_v26, %v1755_v35 }
 0x840   :  { %v1858_v3 = vsub.f32 1.0, %v1857_v60  ;;  %2124 = vmatpush.msk.msra.mxu1 %vm1871_vm14, %v1874_v1  ;;  %2132 = vmatpush.msk.msra.mxu3 %vm3351_vm15, %v1874_v1  ;;  %v1989_v5 = vmul.f32 %v1988_v59, %v3322_v41  ;;  %vm1997_vm15 = vmor %vm1995_vm12, %vm1996_vm11 }
 0x841   :  { %v1992_v4 = vsub.f32 1.0, %v1991_v30  ;;  %2125 = vmatmul.msk.f32.vlgmr.msra.gmra.mxu1 %vm428_vm2, %v1855_v0 }
 0x842   :  { %v1859_v7 = vmul.f32 %v2201_v50, %v1858_v3  ;;  %2133 = vmatmul.msk.f32.vlgmr.msra.gmra.mxu3 %vm428_vm2, %v1989_v5 }
 0x843   :  { %v1993_v8 = vmul.f32 %v2203_v53, %v1992_v4 }
 0x844   :  { %v1860_v10 = vadd.f32 %v2201_v50, %v1859_v7 }
 0x845   :  { %v1994_v13 = vadd.f32 %v2203_v53, %v1993_v8 }
 0x846   :  { %v1864_v14 = vsel %vm1863_vm3, %v2201_v50, %v1860_v10 }
 0x847   :  { %v1869_v34 = vsel %vm1866_vm13, %v1868_v11, %v1864_v14  ;;  %v1998_v17 = vsel %vm1997_vm15, %v2203_v53, %v1994_v13 }
 0x848   :  { %v1870_v41 = vmul.f32 %v1869_v34, %v3328_v25  ;;  %v2003_v18 = vsel %vm2000_vm4, %v2002_v16, %v1998_v17 }
 0x849   :  { %v2004_v19 = vmul.f32 %v2003_v18, %v3334_v57 }
 0x84a   :  { %2126 = vmatmul.msk.f32.gmra.mxu1 %vm428_vm2, %v1870_v41 }
 0x84b   :  { %2134 = vmatmul.msk.f32.gmra.mxu3 %vm428_vm2, %v2004_v19 }
 0x8be   :  { %v1904_v20 = vpop.f32.mrf.mxu1 }
 0x8bf   :  { %v1910_v28 = vadd.f32 %v1904_v20, %v1775_v31 }
 0x8c5   :  { %v2033_v32 = vpop.f32.mrf.mxu3 }
 0x8c6   :  { %v2039_v25 = vadd.f32 %v2033_v32, %v1910_v28 }
 0x8c7   :  { %v1907_v36 = vpop.f32.mrf.mxu1 }
 0x8c8   :  { %v2043_v57 = vand.u32 2147483647, %v2039_v25  ;;  %v1911_v23 = vadd.f32 %v1907_v36, %v1778_v37  ;;  %v2041_v49 = vmax.f32 %v2039_v25, 0.0 }
 0x8ca   :  { %v2045_v38 = vsub.f32 0.0, %v2043_v57 }
 0x8cc   :  { %v2047_v58 = vmul.f32 1.442695, %v2045_v38 }
 0x8ce   :  { %v2036_v39 = vpop.f32.mrf.mxu3  ;;  %2204 = vpow2.f32 %v2047_v58 }
 0x8cf   :  { %v2040_v15 = vadd.f32 %v2036_v39, %v1911_v23 }
 0x8d1   :  { %v2044_v40 = vand.u32 2147483647, %v2040_v15  ;;  %v2042_v50 = vmax.f32 %v2040_v15, 0.0 }
 0x8d3   :  { %v2046_v42 = vsub.f32 0.0, %v2044_v40 }
 0x8d4   :  { %v2205_v24 = vpop.eup %2204 }
 0x8d5   :  { %v2049_v44 = vmul.f32 1.442695, %v2046_v42  ;;  %v2051_v33 = vadd.f32 1.0, %v2205_v24 }
 0x8d7   :  { %2206 = vpow2.f32 %v2049_v44 }
 0x8d8   :  { %2208 = vlog2.f32 %v2051_v33 }
 0x8dd   :  { %v2207_v45 = vpop.eup %2206 }
 0x8de   :  { %v2209_v46 = vpop.eup %2208  ;;  %v2052_v56 = vadd.f32 1.0, %v2207_v45 }
 0x8df   :  { %v2054_v12 = vmul.f32 0.6931472, %v2209_v46 }
 0x8e0   :  { %2210 = vlog2.f32 %v2052_v56 }
 0x8e1   :  { %v2057_v47 = vadd.f32 %v2054_v12, %v2041_v49 }
 0x8e3   :  { %v2059_v22 = vadd.f32 1e-07, %v2057_v47 }
 0x8e5   :  { %v2061_v43 = vsel %vm1871_vm14, %v2039_v25, %v2059_v22 }
 0x8e6   :  { %v2211_v48 = vpop.eup %2210  ;;  %2063 = vst.msk [vmem:[#allocation14] sm:$0xff] %vm195_vm0, %v2061_v43 }
 0x8e7   :  { %v2056_v51 = vmul.f32 0.6931472, %v2211_v48 }
 0x8e9   :  { %v2058_v27 = vadd.f32 %v2056_v51, %v2042_v50 }
 0x8eb   :  { %v2060_v52 = vadd.f32 1e-07, %v2058_v27 }
 0x8ed   :  { %v2062_v53 = vsel %vm1871_vm14, %v2040_v15, %v2060_v52 }
 0x8ee   :  { %2064 = vst.msk [vmem:[#allocation14 + $0x8] sm:$0xff] %vm195_vm0, %v2062_v53 }
 0x8ef   :  { %2077 = dma.vmem_to_hbm [thread:$0]  %s2070_s30, 256, %s2072_s18, [#allocation4], %s3413_s6, %s3413_s6, %s2416_s22  }
 0x8f0   :  { %2412 = dma.done.wait [#allocation4], 256  }
 0x8f1   :  { %2413 = vsyncadd [#allocation4], 4294967040 }
 0x8f2   :  { %2082 = vsyncpa [#allocation3], 1 }
 0x8f3   :  { %2083 = vsyncpa [#allocation6], 1 }
 0x8f4   :  { %2084 = vsyncpa [#allocation9], 1 }
 0x8f5   :  { %2085 = vsyncpa [#allocation12], 1 }
 0x8f6   :  { %2086 = vsyncpa [#allocation4], 1 }

</bundles_post_ra>
